<compile_context>
chip_gen: v7x
topology: tpu7x:2x2x1
jax: 0.10.0
libtpu: 0.0.40
codegen_flags: <defaults>
</compile_context>

<pallas_src>
import functools
from math import sqrt

import jax
import jax.numpy as jnp
from jax.experimental import pallas as pl
from jax.experimental.pallas import tpu as pltpu


def _round_up(x, m):
    return ((x + m - 1) // m) * m


def _neg_log_sigmoid(x):
    # -log(sigmoid(x)) = softplus(-x) = max(-x, 0) + log(1 + exp(-|x|))
    z = -x
    return jnp.maximum(z, 0.0) + jnp.log(1.0 + jnp.exp(-jnp.abs(z)))


def _choose_tb(batch, per_col_bytes, budget_bytes=6 * 1024 * 1024):
    """Batch tile (lane) width: multiple of 128, sized from a VMEM budget."""
    cap = (budget_bytes // max(per_col_bytes, 1)) // 128 * 128
    cap = max(128, min(1024, cap))
    b128 = _round_up(max(batch, 1), 128)
    if b128 <= cap:
        return b128                       # one tile covers the whole batch
    tb = cap
    if tb >= 256:
        tiles = (b128 + tb - 1) // tb
        # Prefer an even grid so v7x's two TensorCores split the "parallel"
        # batch axis evenly.
        if tiles % 2 == 1 and ((b128 + tb // 2 - 1) // (tb // 2)) % 2 == 0:
            tb //= 2
    return tb


def _compiler_params():
    return pltpu.CompilerParams(
        dimension_semantics=("parallel",),
        vmem_limit_bytes=32 * 1024 * 1024,   # >= v5e default, <= v6e/v7x scoped
    )


# ---------------------------------------------------------------------------
# Fused path: tables resident in VMEM, in-kernel one-hot MXU gather
# ---------------------------------------------------------------------------

def _onehot_gather(table_t, idx_row):
    """Gather columns of (D, V) table_t by idx_row (1, TB) -> (D, TB) f32."""
    v = table_t.shape[1]
    tb = idx_row.shape[-1]
    iota = jax.lax.broadcasted_iota(jnp.int32, (v, tb), 0)
    onehot = (iota == idx_row).astype(table_t.dtype)           # (V, TB)
    return jnp.dot(table_t, onehot, preferred_element_type=jnp.float32)


def sgns_fused_kernel(emb_t_ref, out_emb_t_ref, in_idx_ref, pos_idx_ref,
                      neg_idx_ref, out_ref, *, clamp, num_neg):
    emb_t = emb_t_ref[...]           # (D, V_pad), native dtype
    out_t = out_emb_t_ref[...]       # (D, V_pad)

    x = _onehot_gather(emb_t, in_idx_ref[...])                 # (D, TB) f32
    p = _onehot_gather(out_t, pos_idx_ref[...])                # (D, TB) f32

    pos_score = jnp.clip(jnp.sum(x * p, axis=0, keepdims=True), -clamp, clamp)
    loss = _neg_log_sigmoid(pos_score)                         # (1, TB)

    for k in range(num_neg):
        nk = _onehot_gather(out_t, neg_idx_ref[pl.ds(k, 1), :])
        s = jnp.clip(jnp.sum(x * nk, axis=0, keepdims=True), -clamp, clamp)
        loss = loss + _neg_log_sigmoid(-s)

    out_ref[...] = loss                                        # lane-dense row


def _forward_fused(embeddings, out_embeddings, inputs, positive_outputs,
                   negative_outputs, inner_product_clamp):
    vocab, dim = embeddings.shape
    batch = inputs.shape[0]
    num_neg = negative_outputs.shape[1]
    itemsize = jnp.dtype(embeddings.dtype).itemsize

    v_pad = _round_up(vocab, 128)
    if v_pad != vocab:
        zpad = ((0, v_pad - vocab), (0, 0))
        embeddings = jnp.pad(embeddings, zpad)
        out_embeddings = jnp.pad(out_embeddings, zpad)
    emb_t = embeddings.T                       # (D, V_pad)
    out_emb_t = out_embeddings.T               # (D, V_pad)

    # Bytes per batch column in VMEM: idx/out blocks (double-buffered) plus
    # the one-hot temporary and a few (D, TB) f32 temporaries.
    per_col = 4 * (2 * (num_neg + 3) + v_pad + 6 * dim)
    tb = _choose_tb(batch, per_col)
    b_pad = _round_up(batch, tb)
    if b_pad != batch:
        pad = b_pad - batch
        inputs = jnp.pad(inputs, (0, pad))                 # pads with index 0
        positive_outputs = jnp.pad(positive_outputs, (0, pad))
        negative_outputs = jnp.pad(negative_outputs, ((0, pad), (0, 0)))

    in_idx = inputs.astype(jnp.int32).reshape(1, b_pad)
    pos_idx = positive_outputs.astype(jnp.int32).reshape(1, b_pad)
    neg_idx = negative_outputs.astype(jnp.int32).T             # (K, B_pad)

    num_tiles = b_pad // tb
    kernel = functools.partial(sgns_fused_kernel,
                               clamp=float(inner_product_clamp),
                               num_neg=num_neg)
    cost = pl.CostEstimate(
        flops=int(b_pad * ((num_neg + 2) * 2 * v_pad * dim
                           + (num_neg + 1) * 2 * dim)),
        transcendentals=int(2 * b_pad * (num_neg + 1)),
        bytes_accessed=int(2 * v_pad * dim * itemsize
                           + b_pad * (num_neg + 3) * 4),
    )

    loss_row = pl.pallas_call(
        kernel,
        out_shape=jax.ShapeDtypeStruct((1, b_pad), jnp.float32),
        grid_spec=pltpu.PrefetchScalarGridSpec(
            num_scalar_prefetch=0,
            grid=(num_tiles,),
            in_specs=[
                pl.BlockSpec((dim, v_pad), lambda i: (0, 0)),    # emb^T (resident)
                pl.BlockSpec((dim, v_pad), lambda i: (0, 0)),    # out_emb^T
                pl.BlockSpec((1, tb), lambda i: (0, i)),         # input idx
                pl.BlockSpec((1, tb), lambda i: (0, i)),         # positive idx
                pl.BlockSpec((num_neg, tb), lambda i: (0, i)),   # negative idx
            ],
            out_specs=pl.BlockSpec((1, tb), lambda i: (0, i)),
        ),
        compiler_params=_compiler_params(),
        cost_estimate=cost,
    )(emb_t, out_emb_t, in_idx, pos_idx, neg_idx)

    return loss_row[0, :batch]


# ---------------------------------------------------------------------------
# Fallback path: XLA gather in the wrapper (transposed), Pallas scores + loss
# ---------------------------------------------------------------------------

def sgns_gathered_kernel(x_ref, p_ref, n_ref, out_ref, *, clamp, num_neg, dim):
    x = x_ref[...].astype(jnp.float32)                         # (D, TB)
    p = p_ref[...].astype(jnp.float32)                         # (D, TB)

    pos_score = jnp.clip(jnp.sum(x * p, axis=0, keepdims=True), -clamp, clamp)
    loss = _neg_log_sigmoid(pos_score)                         # (1, TB)

    for k in range(num_neg):
        nk = n_ref[pl.ds(k * dim, dim), :].astype(jnp.float32)
        s = jnp.clip(jnp.sum(x * nk, axis=0, keepdims=True), -clamp, clamp)
        loss = loss + _neg_log_sigmoid(-s)

    out_ref[...] = loss


def _forward_gathered(embeddings, out_embeddings, inputs, positive_outputs,
                      negative_outputs, inner_product_clamp):
    # TODO(synk): for very large vocabularies the row gather stays in XLA; an
    # in-kernel per-row DMA gather (tables in pl.ANY + make_async_copy) would
    # remove the HBM round-trip but costs thousands of tiny DMA descriptors.
    vocab, dim = embeddings.shape
    batch = inputs.shape[0]
    num_neg = negative_outputs.shape[1]
    itemsize = jnp.dtype(embeddings.dtype).itemsize

    per_col = itemsize * (num_neg + 2) * dim * 2 + 4 * (4 * dim + 2)
    tb = _choose_tb(batch, per_col)
    b_pad = _round_up(batch, tb)
    if b_pad != batch:
        pad = b_pad - batch
        inputs = jnp.pad(inputs, (0, pad))
        positive_outputs = jnp.pad(positive_outputs, (0, pad))
        negative_outputs = jnp.pad(negative_outputs, ((0, pad), (0, 0)))

    # Gathers stay in the parameter dtype; the kernel casts per-tile to f32.
    x_t = jnp.take(embeddings, inputs, axis=0).T                     # (D, B_pad)
    p_t = jnp.take(out_embeddings, positive_outputs, axis=0).T       # (D, B_pad)
    n_t = jnp.transpose(jnp.take(out_embeddings, negative_outputs, axis=0),
                        (1, 2, 0)).reshape(num_neg * dim, b_pad)     # (K*D, B_pad)

    num_tiles = b_pad // tb
    kernel = functools.partial(sgns_gathered_kernel,
                               clamp=float(inner_product_clamp),
                               num_neg=num_neg, dim=dim)
    cost = pl.CostEstimate(
        flops=int(b_pad * (num_neg + 1) * 2 * dim),
        transcendentals=int(2 * b_pad * (num_neg + 1)),
        bytes_accessed=int(b_pad * (num_neg + 2) * dim * itemsize + b_pad * 4),
    )

    loss_row = pl.pallas_call(
        kernel,
        out_shape=jax.ShapeDtypeStruct((1, b_pad), jnp.float32),
        grid_spec=pltpu.PrefetchScalarGridSpec(
            num_scalar_prefetch=0,
            grid=(num_tiles,),
            in_specs=[
                pl.BlockSpec((dim, tb), lambda i: (0, i)),
                pl.BlockSpec((dim, tb), lambda i: (0, i)),
                pl.BlockSpec((num_neg * dim, tb), lambda i: (0, i)),
            ],
            out_specs=pl.BlockSpec((1, tb), lambda i: (0, i)),
        ),
        compiler_params=_compiler_params(),
        cost_estimate=cost,
    )(x_t, p_t, n_t)

    return loss_row[0, :batch]


def sgns_forward(embeddings, out_embeddings, inputs, positive_outputs,
                 negative_outputs, inner_product_clamp):
    vocab, dim = embeddings.shape
    itemsize = jnp.dtype(embeddings.dtype).itemsize
    v_pad = _round_up(vocab, 128)
    # Fuse the gather only when both (transposed) tables comfortably fit in
    # VMEM next to the per-tile blocks and the one-hot matmul stays cheap.
    if v_pad <= 2048 and 2 * v_pad * dim * itemsize <= 2 * 1024 * 1024:
        return _forward_fused(embeddings, out_embeddings, inputs,
                              positive_outputs, negative_outputs,
                              inner_product_clamp)
    return _forward_gathered(embeddings, out_embeddings, inputs,
                             positive_outputs, negative_outputs,
                             inner_product_clamp)


def reference_forward(embeddings, out_embeddings, inputs, positive_outputs,
                      negative_outputs, clamp):
    in_emb = embeddings[inputs]
    pos_emb = out_embeddings[positive_outputs]
    neg_emb = out_embeddings[negative_outputs]
    pos_score = jnp.clip(jnp.sum(in_emb * pos_emb, axis=1), -clamp, clamp)
    pos_loss = -jax.nn.log_sigmoid(pos_score)
    neg_scores = jnp.clip(jnp.sum(in_emb[:, None, :] * neg_emb, axis=2),
                          -clamp, clamp)
    neg_loss = jnp.sum(-jax.nn.log_sigmoid(-neg_scores), axis=1)
    return pos_loss + neg_loss


if __name__ == "__main__":
    VOCAB_SIZE = 50            # stands in for data_hyperparameters.VOCAB_SIZE + 2
    EMBEDDING_DIM = 32
    NUM_NEGATIVE_SAMPLES = 5
    INNER_PRODUCT_CLAMP = 4.0

    key = jax.random.PRNGKey(0)
    k_emb, k_out, k_in, k_pos, k_neg = jax.random.split(key, 5)

    max_weight = 1.0 / sqrt(EMBEDDING_DIM)
    embeddings = jax.random.uniform(
        k_emb, (VOCAB_SIZE, EMBEDDING_DIM), jnp.float32,
        minval=-max_weight, maxval=max_weight)
    out_embeddings = jax.random.uniform(
        k_out, (VOCAB_SIZE, EMBEDDING_DIM), jnp.float32,
        minval=-max_weight, maxval=max_weight)
    # Test aid only: make the parameter values bf16-representable so the
    # in-kernel one-hot MXU gather is exact under any matmul precision.
    embeddings = embeddings.astype(jnp.bfloat16).astype(jnp.float32)
    out_embeddings = out_embeddings.astype(jnp.bfloat16).astype(jnp.float32)

    # Case 1: small batch (single 128-lane tile, fused gather path).
    BATCH = 8
    inputs = jax.random.randint(k_in, (BATCH,), 0, VOCAB_SIZE, jnp.int32)
    positive_outputs = jax.random.randint(k_pos, (BATCH,), 0, VOCAB_SIZE,
                                          jnp.int32)
    negative_outputs = jax.random.randint(
        k_neg, (BATCH, NUM_NEGATIVE_SAMPLES), 0, VOCAB_SIZE, jnp.int32)

    loss = jax.block_until_ready(
        sgns_forward(embeddings, out_embeddings, inputs, positive_outputs,
                     negative_outputs, INNER_PRODUCT_CLAMP))
    ref = reference_forward(embeddings, out_embeddings, inputs,
                            positive_outputs, negative_outputs,
                            INNER_PRODUCT_CLAMP)
    assert loss.shape == (BATCH,)
    assert jnp.allclose(loss, ref, atol=1e-4, rtol=1e-4)

    # Case 2: larger batch exercising padding + wide lane tiles (fused path).
    BATCH2 = 1000
    k_in2, k_pos2, k_neg2 = jax.random.split(jax.random.PRNGKey(1), 3)
    inputs2 = jax.random.randint(k_in2, (BATCH2,), 0, VOCAB_SIZE, jnp.int32)
    positive2 = jax.random.randint(k_pos2, (BATCH2,), 0, VOCAB_SIZE, jnp.int32)
    negative2 = jax.random.randint(
        k_neg2, (BATCH2, NUM_NEGATIVE_SAMPLES), 0, VOCAB_SIZE, jnp.int32)

    loss2 = jax.block_until_ready(
        sgns_forward(embeddings, out_embeddings, inputs2, positive2,
                     negative2, INNER_PRODUCT_CLAMP))
    ref2 = reference_forward(embeddings, out_embeddings, inputs2, positive2,
                             negative2, INNER_PRODUCT_CLAMP)
    assert loss2.shape == (BATCH2,)
    assert jnp.allclose(loss2, ref2, atol=1e-4, rtol=1e-4)

    # Case 3: exercise the large-vocab fallback (pre-gathered, transposed).
    loss3 = jax.block_until_ready(
        _forward_gathered(embeddings, out_embeddings, inputs,
                          positive_outputs, negative_outputs,
                          INNER_PRODUCT_CLAMP))
    assert loss3.shape == (BATCH,)
    assert jnp.allclose(loss3, ref, atol=1e-4, rtol=1e-4)

    print("KERNEL_OK")
</pallas_src>

<mosaic_0001>
module attributes {stable_mosaic.version = 11 : i64} {
  func.func @sgns_fused_kernel(%arg0: i32, %arg1: memref<32x128xf32, #tpu.memory_space<vmem>>, %arg2: memref<32x128xf32, #tpu.memory_space<vmem>>, %arg3: memref<1x128xi32, #tpu.memory_space<vmem>>, %arg4: memref<1x128xi32, #tpu.memory_space<vmem>>, %arg5: memref<5x128xi32, #tpu.memory_space<vmem>>, %arg6: memref<1x128xf32, #tpu.memory_space<vmem>>) attributes {dimension_semantics = [#tpu.dimension_semantics<parallel>], iteration_bounds = array<i64: 1>, scalar_prefetch = 0 : i64, scratch_operands = 0 : i64, tpu.core_type = #tpu.core_type<tc>, window_params = [{pipeline_mode = #tpu.pipeline_mode<synchronous>, transform_indices = @transform_0, window_bounds = array<i64: 32, 128>}, {pipeline_mode = #tpu.pipeline_mode<synchronous>, transform_indices = @transform_1, window_bounds = array<i64: 32, 128>}, {transform_indices = @transform_2, window_bounds = array<i64: 1, 128>}, {transform_indices = @transform_3, window_bounds = array<i64: 1, 128>}, {transform_indices = @transform_4, window_bounds = array<i64: 5, 128>}, {transform_indices = @transform_5, window_bounds = array<i64: 1, 128>}]} {
    %c0 = arith.constant 0 : index
    %c0_0 = arith.constant 0 : index
    %0 = vector.load %arg1[%c0, %c0_0] : memref<32x128xf32, #tpu.memory_space<vmem>>, vector<32x128xf32>
    %c0_1 = arith.constant 0 : index
    %c0_2 = arith.constant 0 : index
    %1 = vector.load %arg2[%c0_1, %c0_2] : memref<32x128xf32, #tpu.memory_space<vmem>>, vector<32x128xf32>
    %c0_3 = arith.constant 0 : index
    %c0_4 = arith.constant 0 : index
    %2 = vector.load %arg3[%c0_3, %c0_4] : memref<1x128xi32, #tpu.memory_space<vmem>>, vector<1x128xi32>
    %3 = tpu.iota {dimensions = array<i32: 0>} : vector<128x128xi32>
    %4 = vector.broadcast %2 : vector<1x128xi32> to vector<128x128xi32>
    %5 = arith.cmpi eq, %3, %4 : vector<128x128xi32>
    %6 = arith.extui %5 : vector<128x128xi1> to vector<128x128xi32>
    %7 = arith.sitofp %6 : vector<128x128xi32> to vector<128x128xf32>
    %cst = arith.constant dense<0.000000e+00> : vector<32x128xf32>
    %8 = tpu.matmul %0, %7, %cst {dimension_numbers = #tpu.dot_dimension_numbers<[1], [0], [0], [1], [0, 0, 1, 1], [], []>} : vector<32x128xf32>, vector<128x128xf32>, vector<32x128xf32> -> vector<32x128xf32>
    %c0_5 = arith.constant 0 : index
    %c0_6 = arith.constant 0 : index
    %9 = vector.load %arg4[%c0_5, %c0_6] : memref<1x128xi32, #tpu.memory_space<vmem>>, vector<1x128xi32>
    %10 = tpu.iota {dimensions = array<i32: 0>} : vector<128x128xi32>
    %11 = vector.broadcast %9 : vector<1x128xi32> to vector<128x128xi32>
    %12 = arith.cmpi eq, %10, %11 : vector<128x128xi32>
    %13 = arith.extui %12 : vector<128x128xi1> to vector<128x128xi32>
    %14 = arith.sitofp %13 : vector<128x128xi32> to vector<128x128xf32>
    %cst_7 = arith.constant dense<0.000000e+00> : vector<32x128xf32>
    %15 = tpu.matmul %1, %14, %cst_7 {dimension_numbers = #tpu.dot_dimension_numbers<[1], [0], [0], [1], [0, 0, 1, 1], [], []>} : vector<32x128xf32>, vector<128x128xf32>, vector<32x128xf32> -> vector<32x128xf32>
    %16 = arith.mulf %8, %15 : vector<32x128xf32>
    %cst_8 = arith.constant dense<0.000000e+00> : vector<128xf32>
    %17 = vector.multi_reduction <add>, %16, %cst_8 [0] : vector<32x128xf32> to vector<128xf32>
    %18 = vector.shape_cast %17 : vector<128xf32> to vector<1x128xf32>
    %cst_9 = arith.constant -4.000000e+00 : f32
    %cst_10 = arith.constant 4.000000e+00 : f32
    %19 = vector.broadcast %cst_9 : f32 to vector<1x128xf32>
    %20 = arith.maximumf %19, %18 : vector<1x128xf32>
    %21 = vector.broadcast %cst_10 : f32 to vector<1x128xf32>
    %22 = arith.minimumf %21, %20 : vector<1x128xf32>
    %cst_11 = arith.constant 0.000000e+00 : f32
    %23 = vector.broadcast %cst_11 : f32 to vector<1x128xf32>
    %24 = arith.subf %23, %22 : vector<1x128xf32>
    %cst_12 = arith.constant 0.000000e+00 : f32
    %25 = vector.broadcast %cst_12 : f32 to vector<1x128xf32>
    %26 = arith.maximumf %24, %25 : vector<1x128xf32>
    %27 = math.absf %24 : vector<1x128xf32>
    %cst_13 = arith.constant 0.000000e+00 : f32
    %28 = vector.broadcast %cst_13 : f32 to vector<1x128xf32>
    %29 = arith.subf %28, %27 : vector<1x128xf32>
    %30 = math.exp %29 : vector<1x128xf32>
    %cst_14 = arith.constant 1.000000e+00 : f32
    %31 = vector.broadcast %cst_14 : f32 to vector<1x128xf32>
    %32 = arith.addf %31, %30 : vector<1x128xf32>
    %33 = math.log %32 : vector<1x128xf32>
    %34 = arith.addf %26, %33 : vector<1x128xf32>
    %c0_15 = arith.constant 0 : index
    %c0_16 = arith.constant 0 : index
    %35 = vector.load %arg5[%c0_15, %c0_16] : memref<5x128xi32, #tpu.memory_space<vmem>>, vector<1x128xi32>
    %36 = tpu.iota {dimensions = array<i32: 0>} : vector<128x128xi32>
    %37 = vector.broadcast %35 : vector<1x128xi32> to vector<128x128xi32>
    %38 = arith.cmpi eq, %36, %37 : vector<128x128xi32>
    %39 = arith.extui %38 : vector<128x128xi1> to vector<128x128xi32>
    %40 = arith.sitofp %39 : vector<128x128xi32> to vector<128x128xf32>
    %cst_17 = arith.constant dense<0.000000e+00> : vector<32x128xf32>
    %41 = tpu.matmul %1, %40, %cst_17 {dimension_numbers = #tpu.dot_dimension_numbers<[1], [0], [0], [1], [0, 0, 1, 1], [], []>} : vector<32x128xf32>, vector<128x128xf32>, vector<32x128xf32> -> vector<32x128xf32>
    %42 = arith.mulf %8, %41 : vector<32x128xf32>
    %cst_18 = arith.constant dense<0.000000e+00> : vector<128xf32>
    %43 = vector.multi_reduction <add>, %42, %cst_18 [0] : vector<32x128xf32> to vector<128xf32>
    %44 = vector.shape_cast %43 : vector<128xf32> to vector<1x128xf32>
    %cst_19 = arith.constant -4.000000e+00 : f32
    %cst_20 = arith.constant 4.000000e+00 : f32
    %45 = vector.broadcast %cst_19 : f32 to vector<1x128xf32>
    %46 = arith.maximumf %45, %44 : vector<1x128xf32>
    %47 = vector.broadcast %cst_20 : f32 to vector<1x128xf32>
    %48 = arith.minimumf %47, %46 : vector<1x128xf32>
    %cst_21 = arith.constant 0.000000e+00 : f32
    %49 = vector.broadcast %cst_21 : f32 to vector<1x128xf32>
    %50 = arith.subf %49, %48 : vector<1x128xf32>
    %cst_22 = arith.constant 0.000000e+00 : f32
    %51 = vector.broadcast %cst_22 : f32 to vector<1x128xf32>
    %52 = arith.subf %51, %50 : vector<1x128xf32>
    %cst_23 = arith.constant 0.000000e+00 : f32
    %53 = vector.broadcast %cst_23 : f32 to vector<1x128xf32>
    %54 = arith.maximumf %52, %53 : vector<1x128xf32>
    %55 = math.absf %52 : vector<1x128xf32>
    %cst_24 = arith.constant 0.000000e+00 : f32
    %56 = vector.broadcast %cst_24 : f32 to vector<1x128xf32>
    %57 = arith.subf %56, %55 : vector<1x128xf32>
    %58 = math.exp %57 : vector<1x128xf32>
    %cst_25 = arith.constant 1.000000e+00 : f32
    %59 = vector.broadcast %cst_25 : f32 to vector<1x128xf32>
    %60 = arith.addf %59, %58 : vector<1x128xf32>
    %61 = math.log %60 : vector<1x128xf32>
    %62 = arith.addf %54, %61 : vector<1x128xf32>
    %63 = arith.addf %34, %62 : vector<1x128xf32>
    %c1 = arith.constant 1 : index
    %c0_26 = arith.constant 0 : index
    %64 = vector.load %arg5[%c1, %c0_26] : memref<5x128xi32, #tpu.memory_space<vmem>>, vector<1x128xi32>
    %65 = tpu.iota {dimensions = array<i32: 0>} : vector<128x128xi32>
    %66 = vector.broadcast %64 : vector<1x128xi32> to vector<128x128xi32>
    %67 = arith.cmpi eq, %65, %66 : vector<128x128xi32>
    %68 = arith.extui %67 : vector<128x128xi1> to vector<128x128xi32>
    %69 = arith.sitofp %68 : vector<128x128xi32> to vector<128x128xf32>
    %cst_27 = arith.constant dense<0.000000e+00> : vector<32x128xf32>
    %70 = tpu.matmul %1, %69, %cst_27 {dimension_numbers = #tpu.dot_dimension_numbers<[1], [0], [0], [1], [0, 0, 1, 1], [], []>} : vector<32x128xf32>, vector<128x128xf32>, vector<32x128xf32> -> vector<32x128xf32>
    %71 = arith.mulf %8, %70 : vector<32x128xf32>
    %cst_28 = arith.constant dense<0.000000e+00> : vector<128xf32>
    %72 = vector.multi_reduction <add>, %71, %cst_28 [0] : vector<32x128xf32> to vector<128xf32>
    %73 = vector.shape_cast %72 : vector<128xf32> to vector<1x128xf32>
    %cst_29 = arith.constant -4.000000e+00 : f32
    %cst_30 = arith.constant 4.000000e+00 : f32
    %74 = vector.broadcast %cst_29 : f32 to vector<1x128xf32>
    %75 = arith.maximumf %74, %73 : vector<1x128xf32>
    %76 = vector.broadcast %cst_30 : f32 to vector<1x128xf32>
    %77 = arith.minimumf %76, %75 : vector<1x128xf32>
    %cst_31 = arith.constant 0.000000e+00 : f32
    %78 = vector.broadcast %cst_31 : f32 to vector<1x128xf32>
    %79 = arith.subf %78, %77 : vector<1x128xf32>
    %cst_32 = arith.constant 0.000000e+00 : f32
    %80 = vector.broadcast %cst_32 : f32 to vector<1x128xf32>
    %81 = arith.subf %80, %79 : vector<1x128xf32>
    %cst_33 = arith.constant 0.000000e+00 : f32
    %82 = vector.broadcast %cst_33 : f32 to vector<1x128xf32>
    %83 = arith.maximumf %81, %82 : vector<1x128xf32>
    %84 = math.absf %81 : vector<1x128xf32>
    %cst_34 = arith.constant 0.000000e+00 : f32
    %85 = vector.broadcast %cst_34 : f32 to vector<1x128xf32>
    %86 = arith.subf %85, %84 : vector<1x128xf32>
    %87 = math.exp %86 : vector<1x128xf32>
    %cst_35 = arith.constant 1.000000e+00 : f32
    %88 = vector.broadcast %cst_35 : f32 to vector<1x128xf32>
    %89 = arith.addf %88, %87 : vector<1x128xf32>
    %90 = math.log %89 : vector<1x128xf32>
    %91 = arith.addf %83, %90 : vector<1x128xf32>
    %92 = arith.addf %63, %91 : vector<1x128xf32>
    %c2 = arith.constant 2 : index
    %c0_36 = arith.constant 0 : index
    %93 = vector.load %arg5[%c2, %c0_36] : memref<5x128xi32, #tpu.memory_space<vmem>>, vector<1x128xi32>
    %94 = tpu.iota {dimensions = array<i32: 0>} : vector<128x128xi32>
    %95 = vector.broadcast %93 : vector<1x128xi32> to vector<128x128xi32>
    %96 = arith.cmpi eq, %94, %95 : vector<128x128xi32>
    %97 = arith.extui %96 : vector<128x128xi1> to vector<128x128xi32>
    %98 = arith.sitofp %97 : vector<128x128xi32> to vector<128x128xf32>
    %cst_37 = arith.constant dense<0.000000e+00> : vector<32x128xf32>
    %99 = tpu.matmul %1, %98, %cst_37 {dimension_numbers = #tpu.dot_dimension_numbers<[1], [0], [0], [1], [0, 0, 1, 1], [], []>} : vector<32x128xf32>, vector<128x128xf32>, vector<32x128xf32> -> vector<32x128xf32>
    %100 = arith.mulf %8, %99 : vector<32x128xf32>
    %cst_38 = arith.constant dense<0.000000e+00> : vector<128xf32>
    %101 = vector.multi_reduction <add>, %100, %cst_38 [0] : vector<32x128xf32> to vector<128xf32>
    %102 = vector.shape_cast %101 : vector<128xf32> to vector<1x128xf32>
    %cst_39 = arith.constant -4.000000e+00 : f32
    %cst_40 = arith.constant 4.000000e+00 : f32
    %103 = vector.broadcast %cst_39 : f32 to vector<1x128xf32>
    %104 = arith.maximumf %103, %102 : vector<1x128xf32>
    %105 = vector.broadcast %cst_40 : f32 to vector<1x128xf32>
    %106 = arith.minimumf %105, %104 : vector<1x128xf32>
    %cst_41 = arith.constant 0.000000e+00 : f32
    %107 = vector.broadcast %cst_41 : f32 to vector<1x128xf32>
    %108 = arith.subf %107, %106 : vector<1x128xf32>
    %cst_42 = arith.constant 0.000000e+00 : f32
    %109 = vector.broadcast %cst_42 : f32 to vector<1x128xf32>
    %110 = arith.subf %109, %108 : vector<1x128xf32>
    %cst_43 = arith.constant 0.000000e+00 : f32
    %111 = vector.broadcast %cst_43 : f32 to vector<1x128xf32>
    %112 = arith.maximumf %110, %111 : vector<1x128xf32>
    %113 = math.absf %110 : vector<1x128xf32>
    %cst_44 = arith.constant 0.000000e+00 : f32
    %114 = vector.broadcast %cst_44 : f32 to vector<1x128xf32>
    %115 = arith.subf %114, %113 : vector<1x128xf32>
    %116 = math.exp %115 : vector<1x128xf32>
    %cst_45 = arith.constant 1.000000e+00 : f32
    %117 = vector.broadcast %cst_45 : f32 to vector<1x128xf32>
    %118 = arith.addf %117, %116 : vector<1x128xf32>
    %119 = math.log %118 : vector<1x128xf32>
    %120 = arith.addf %112, %119 : vector<1x128xf32>
    %121 = arith.addf %92, %120 : vector<1x128xf32>
    %c3 = arith.constant 3 : index
    %c0_46 = arith.constant 0 : index
    %122 = vector.load %arg5[%c3, %c0_46] : memref<5x128xi32, #tpu.memory_space<vmem>>, vector<1x128xi32>
    %123 = tpu.iota {dimensions = array<i32: 0>} : vector<128x128xi32>
    %124 = vector.broadcast %122 : vector<1x128xi32> to vector<128x128xi32>
    %125 = arith.cmpi eq, %123, %124 : vector<128x128xi32>
    %126 = arith.extui %125 : vector<128x128xi1> to vector<128x128xi32>
    %127 = arith.sitofp %126 : vector<128x128xi32> to vector<128x128xf32>
    %cst_47 = arith.constant dense<0.000000e+00> : vector<32x128xf32>
    %128 = tpu.matmul %1, %127, %cst_47 {dimension_numbers = #tpu.dot_dimension_numbers<[1], [0], [0], [1], [0, 0, 1, 1], [], []>} : vector<32x128xf32>, vector<128x128xf32>, vector<32x128xf32> -> vector<32x128xf32>
    %129 = arith.mulf %8, %128 : vector<32x128xf32>
    %cst_48 = arith.constant dense<0.000000e+00> : vector<128xf32>
    %130 = vector.multi_reduction <add>, %129, %cst_48 [0] : vector<32x128xf32> to vector<128xf32>
    %131 = vector.shape_cast %130 : vector<128xf32> to vector<1x128xf32>
    %cst_49 = arith.constant -4.000000e+00 : f32
    %cst_50 = arith.constant 4.000000e+00 : f32
    %132 = vector.broadcast %cst_49 : f32 to vector<1x128xf32>
    %133 = arith.maximumf %132, %131 : vector<1x128xf32>
    %134 = vector.broadcast %cst_50 : f32 to vector<1x128xf32>
    %135 = arith.minimumf %134, %133 : vector<1x128xf32>
    %cst_51 = arith.constant 0.000000e+00 : f32
    %136 = vector.broadcast %cst_51 : f32 to vector<1x128xf32>
    %137 = arith.subf %136, %135 : vector<1x128xf32>
    %cst_52 = arith.constant 0.000000e+00 : f32
    %138 = vector.broadcast %cst_52 : f32 to vector<1x128xf32>
    %139 = arith.subf %138, %137 : vector<1x128xf32>
    %cst_53 = arith.constant 0.000000e+00 : f32
    %140 = vector.broadcast %cst_53 : f32 to vector<1x128xf32>
    %141 = arith.maximumf %139, %140 : vector<1x128xf32>
    %142 = math.absf %139 : vector<1x128xf32>
    %cst_54 = arith.constant 0.000000e+00 : f32
    %143 = vector.broadcast %cst_54 : f32 to vector<1x128xf32>
    %144 = arith.subf %143, %142 : vector<1x128xf32>
    %145 = math.exp %144 : vector<1x128xf32>
    %cst_55 = arith.constant 1.000000e+00 : f32
    %146 = vector.broadcast %cst_55 : f32 to vector<1x128xf32>
    %147 = arith.addf %146, %145 : vector<1x128xf32>
    %148 = math.log %147 : vector<1x128xf32>
    %149 = arith.addf %141, %148 : vector<1x128xf32>
    %150 = arith.addf %121, %149 : vector<1x128xf32>
    %c4 = arith.constant 4 : index
    %c0_56 = arith.constant 0 : index
    %151 = vector.load %arg5[%c4, %c0_56] : memref<5x128xi32, #tpu.memory_space<vmem>>, vector<1x128xi32>
    %152 = tpu.iota {dimensions = array<i32: 0>} : vector<128x128xi32>
    %153 = vector.broadcast %151 : vector<1x128xi32> to vector<128x128xi32>
    %154 = arith.cmpi eq, %152, %153 : vector<128x128xi32>
    %155 = arith.extui %154 : vector<128x128xi1> to vector<128x128xi32>
    %156 = arith.sitofp %155 : vector<128x128xi32> to vector<128x128xf32>
    %cst_57 = arith.constant dense<0.000000e+00> : vector<32x128xf32>
    %157 = tpu.matmul %1, %156, %cst_57 {dimension_numbers = #tpu.dot_dimension_numbers<[1], [0], [0], [1], [0, 0, 1, 1], [], []>} : vector<32x128xf32>, vector<128x128xf32>, vector<32x128xf32> -> vector<32x128xf32>
    %158 = arith.mulf %8, %157 : vector<32x128xf32>
    %cst_58 = arith.constant dense<0.000000e+00> : vector<128xf32>
    %159 = vector.multi_reduction <add>, %158, %cst_58 [0] : vector<32x128xf32> to vector<128xf32>
    %160 = vector.shape_cast %159 : vector<128xf32> to vector<1x128xf32>
    %cst_59 = arith.constant -4.000000e+00 : f32
    %cst_60 = arith.constant 4.000000e+00 : f32
    %161 = vector.broadcast %cst_59 : f32 to vector<1x128xf32>
    %162 = arith.maximumf %161, %160 : vector<1x128xf32>
    %163 = vector.broadcast %cst_60 : f32 to vector<1x128xf32>
    %164 = arith.minimumf %163, %162 : vector<1x128xf32>
    %cst_61 = arith.constant 0.000000e+00 : f32
    %165 = vector.broadcast %cst_61 : f32 to vector<1x128xf32>
    %166 = arith.subf %165, %164 : vector<1x128xf32>
    %cst_62 = arith.constant 0.000000e+00 : f32
    %167 = vector.broadcast %cst_62 : f32 to vector<1x128xf32>
    %168 = arith.subf %167, %166 : vector<1x128xf32>
    %cst_63 = arith.constant 0.000000e+00 : f32
    %169 = vector.broadcast %cst_63 : f32 to vector<1x128xf32>
    %170 = arith.maximumf %168, %169 : vector<1x128xf32>
    %171 = math.absf %168 : vector<1x128xf32>
    %cst_64 = arith.constant 0.000000e+00 : f32
    %172 = vector.broadcast %cst_64 : f32 to vector<1x128xf32>
    %173 = arith.subf %172, %171 : vector<1x128xf32>
    %174 = math.exp %173 : vector<1x128xf32>
    %cst_65 = arith.constant 1.000000e+00 : f32
    %175 = vector.broadcast %cst_65 : f32 to vector<1x128xf32>
    %176 = arith.addf %175, %174 : vector<1x128xf32>
    %177 = math.log %176 : vector<1x128xf32>
    %178 = arith.addf %170, %177 : vector<1x128xf32>
    %179 = arith.addf %150, %178 : vector<1x128xf32>
    %c0_66 = arith.constant 0 : index
    %c0_67 = arith.constant 0 : index
    %180 = vector.load %arg6[%c0_66, %c0_67] : memref<1x128xf32, #tpu.memory_space<vmem>>, vector<1x128xf32>
    tpu.vector_store %arg6[%c0_66, %c0_67], %179 {strides = array<i32>} : memref<1x128xf32, #tpu.memory_space<vmem>>, vector<1x128xf32>,
    return
  }
  func.func @transform_0(%arg0: i32) -> (i32, i32) {
    %c0_i32 = arith.constant 0 : i32
    %c0_i32_0 = arith.constant 0 : i32
    %c0_i32_1 = arith.constant 0 : i32
    return %c0_i32, %c0_i32_0 : i32, i32
  }
  func.func @transform_1(%arg0: i32) -> (i32, i32) {
    %c0_i32 = arith.constant 0 : i32
    %c0_i32_0 = arith.constant 0 : i32
    %c0_i32_1 = arith.constant 0 : i32
    return %c0_i32, %c0_i32_0 : i32, i32
  }
  func.func @transform_2(%arg0: i32) -> (i32, i32) {
    %c0_i32 = arith.constant 0 : i32
    %c0_i32_0 = arith.constant 0 : i32
    return %c0_i32, %arg0 : i32, i32
  }
  func.func @transform_3(%arg0: i32) -> (i32, i32) {
    %c0_i32 = arith.constant 0 : i32
    %c0_i32_0 = arith.constant 0 : i32
    return %c0_i32, %arg0 : i32, i32
  }
  func.func @transform_4(%arg0: i32) -> (i32, i32) {
    %c0_i32 = arith.constant 0 : i32
    %c0_i32_0 = arith.constant 0 : i32
    return %c0_i32, %arg0 : i32, i32
  }
  func.func @transform_5(%arg0: i32) -> (i32, i32) {
    %c0_i32 = arith.constant 0 : i32
    %c0_i32_0 = arith.constant 0 : i32
    return %c0_i32, %arg0 : i32, i32
  }
}

</mosaic_0001>

<bundles_post_ra>
// kernel: tpu_custom_call.1
= control target key start
LH: loop header
LB: loop body
LE: loop exit
PB: predicated region body
PF: predicated region fallthrough
CT: control target
= control target key end

     0   :  { %10 = vsyncpa [#allocation3], 0  ;;  %s3324_s0 = inlined_call_operand.hbm [shape: f32[32,128], index: 0, kind: input, shape index: {}]   ;;  %s3325_s1 = inlined_call_operand.hbm [shape: f32[32,128], index: 1, kind: input, shape index: {}]   ;;  %s3326_s2 = inlined_call_operand.vmem [shape: s32[1,128], index: 2, kind: input, shape index: {}]   ;;  %s3327_s3 = inlined_call_operand.vmem [shape: s32[1,128], index: 3, kind: input, shape index: {}]   ;;  %s3328_s4 = inlined_call_operand.vmem [shape: s32[5,128], index: 4, kind: input, shape index: {}]   ;;  %s3329_s5 = inlined_call_operand.hbm [shape: f32[1,128], index: 5, kind: output, shape index: {}]  }
   0x1   :  { %11 = vsyncpa [#allocation6], 0 }
   0x2   :  { %12 = vsyncpa [#allocation4], 0  ;;  %s2202_s18 = smov [#allocation2]   ;;  %s2130_s22 = scalar_lea.hbm %s3324_s0, 512 }
   0x3   :  { %s18_s19 = sshll.u32 %s2202_s18, 4  ;;  %p2131_p0 = scmp.ne.s32.totalorder %s3324_s0, %s2130_s22  ;;  %s19_s19 = int_to_ptr.vmem [resolvable:$true] %s18_s19 }
   0x4   :  { %p2134_p1 = scmp.lt.u32.totalorder %s2130_s22, %s3324_s0 }
   0x6   :  { %p2136_p2 = pnand %p2134_p1, %p2131_p0 }
   0x8   :  { %2139 = shalt.err (!%p2136_p2)
}
   0x9   :  { %s2140_s27 = scalar_lea.vmem %s19_s19, 512  ;;  %p2145_p4 = scmp.lt.s32.totalorder %s19_s19, %s19_s19 }
   0xa   :  { %p2141_p3 = scmp.ne.s32.totalorder %s19_s19, %s2140_s27  ;;  %p2146_p5 = scmp.lt.s32.totalorder %s2140_s27, %s2140_s27 }
   0xc   :  { %p2147_p6 = por %p2146_p5, %p2145_p4 }
   0xe   :  { %p2148_p7 = pnand %p2147_p6, %p2141_p3 }
  0x10   :  { %2151 = shalt.err (!%p2148_p7)
}
  0x11   :  { %s2203_s28 = smov 128   ;;  %s2204_s29 = smov 8  }
  0x12   :  { %24 = dma.hbm_to_vmem [thread:$0]  %s3324_s0, 512, %s19_s19, [#allocation3], %s2203_s28, %s2203_s28, %s2204_s29  }
  0x13   :  { %s2205_s7 = smov [#allocation5]   ;;  %s2152_s11 = scalar_lea.hbm %s3325_s1, 512 }
  0x14   :  { %s30_s8 = sshll.u32 %s2205_s7, 4  ;;  %p2153_p8 = scmp.ne.s32.totalorder %s3325_s1, %s2152_s11  ;;  %s31_s8 = int_to_ptr.vmem [resolvable:$true] %s30_s8 }
  0x15   :  { %p2156_p9 = scmp.lt.u32.totalorder %s2152_s11, %s3325_s1 }
  0x17   :  { %p2158_p10 = pnand %p2156_p9, %p2153_p8 }
  0x19   :  { %2161 = shalt.err (!%p2158_p10)
}
  0x1a   :  { %s2162_s16 = scalar_lea.vmem %s31_s8, 512  ;;  %p2167_p12 = scmp.lt.s32.totalorder %s31_s8, %s31_s8 }
  0x1b   :  { %p2163_p11 = scmp.ne.s32.totalorder %s31_s8, %s2162_s16  ;;  %p2168_p13 = scmp.lt.s32.totalorder %s2162_s16, %s2162_s16 }
  0x1d   :  { %p2169_p0 = por %p2168_p13, %p2167_p12 }
  0x1f   :  { %p2170_p1 = pnand %p2169_p0, %p2163_p11 }
  0x21   :  { %2173 = shalt.err (!%p2170_p1)
}
  0x22   :  { %36 = dma.hbm_to_vmem [thread:$0]  %s3325_s1, 512, %s31_s8, [#allocation6], %s2203_s28, %s2203_s28, %s2204_s29  }
  0x23   :  { %2196 = dma.done.wait [#allocation3], 512  }
  0x24   :  { %2197 = vsyncadd [#allocation3], 4294966784 }
  0x25   :  { %2198 = dma.done.wait [#allocation6], 512  }
  0x26   :  { %2199 = vsyncadd [#allocation6], 4294966784  ;;  %v58_v0 = vlaneseq  ;;  %v2282_v7 = vld [vmem:[%s3326_s2] ss:$0 sm:$0xff]  ;;  %v2206_v10 = vmov 1.0|1.0  }
  0x27   :  { %v2287_v8 = vld [vmem:[%s3327_s3] ss:$0 sm:$0xff]  ;;  %v2486_v33 = vld [vmem:[%s3328_s4 + $0x1] ss:$0 sm:$0xff]  ;;  %v2552_v38 = vld [vmem:[%s3328_s4 + $0x3] ss:$0 sm:$0xff] }
  0x28   :  { %v2262_v1 = vshrl.u32 %v58_v0, 7  ;;  %v49_v9 = vld [vmem:[#allocation2] sm:$0xff]  ;;  %v50_v41 = vld [vmem:[#allocation2 + $0x8] sm:$0xff]  ;;  %v51_v46 = vld [vmem:[#allocation2 + $0x10] sm:$0xff]  ;;  %v3393_v50 = vmov 0  ;;  %v3397_v52 = vmov 0 }
  0x29   :  { %1626 = vmatprep.mubr.f32.mxu0 %v49_v9  ;;  %v2322_v13 = vld [vmem:[#allocation5] sm:$0xff]  ;;  %v2596_v44 = vld [vmem:[#allocation5 + $0x8] sm:$0xff]  ;;  %v2634_v48 = vld [vmem:[#allocation5 + $0x10] sm:$0xff]  ;;  %v3400_v54 = vmov 0  ;;  %v3407_v56 = vmov 0  ;;  %v3411_v57 = vmov 0 }
  0x2a   :  { %v2265_v2 = vadd.s32 8, %v2262_v1  ;;  %v2268_v3 = vadd.s32 16, %v2262_v1  ;;  %v2271_v4 = vadd.s32 24, %v2262_v1  ;;  %v2274_v5 = vadd.s32 32, %v2262_v1  ;;  %1664 = vmatprep.mubr.f32.mxu1 %v2322_v13  ;;  %v2473_v31 = vld [vmem:[%s3328_s4] ss:$0 sm:$0xff] }
  0x2b   :  { %v2277_v6 = vadd.s32 40, %v2262_v1  ;;  %vm79_vm0 = vcmp.eq.s32.totalorder %v2262_v1, %v2282_v7  ;;  %vm217_vm2 = vcmp.eq.s32.totalorder %v2262_v1, %v2287_v8  ;;  %v2311_v11 = vadd.s32 48, %v2262_v1  ;;  %v2587_v43 = vld [vmem:[%s3328_s4 + $0x2] ss:$0 sm:$0xff]  ;;  %v52_v51 = vld [vmem:[#allocation2 + $0x18] sm:$0xff] }
  0x2c   :  { %vm80_vm1 = vcmp.eq.s32.totalorder %v2265_v2, %v2282_v7  ;;  %vm218_vm3 = vcmp.eq.s32.totalorder %v2265_v2, %v2287_v8  ;;  %vm81_vm5 = vcmp.eq.s32.totalorder %v2268_v3, %v2282_v7  ;;  %vm82_vm6 = vcmp.eq.s32.totalorder %v2271_v4, %v2282_v7  ;;  %v2687_v53 = vld [vmem:[#allocation5 + $0x18] sm:$0xff] }
  0x2d   :  { %vm1860_vm4 = vmpackc.low %vm80_vm1, %vm79_vm0  ;;  %vm219_vm7 = vcmp.eq.s32.totalorder %v2268_v3, %v2287_v8  ;;  %vm220_vm8 = vcmp.eq.s32.totalorder %v2271_v4, %v2287_v8  ;;  %vm83_vm10 = vcmp.eq.s32.totalorder %v2274_v5, %v2282_v7  ;;  %vm84_vm11 = vcmp.eq.s32.totalorder %v2277_v6, %v2282_v7 }
  0x2e   :  { %1861 = vmatprep.subr.msk.bf16.mxu0 %vm1860_vm4, %v2206_v10  ;;  %vm1892_vm9 = vmpackc.low %vm218_vm3, %vm217_vm2  ;;  %v2314_v12 = vadd.s32 56, %v2262_v1  ;;  %vm221_vm13 = vcmp.eq.s32.totalorder %v2274_v5, %v2287_v8  ;;  %vm222_vm14 = vcmp.eq.s32.totalorder %v2277_v6, %v2287_v8  ;;  %vm85_vm2 = vcmp.eq.s32.totalorder %v2311_v11, %v2282_v7 }
  0x2f   :  { %1893 = vmatprep.subr.msk.bf16.mxu1 %vm1892_vm9, %v2206_v10  ;;  %1863 = vmatpush3.bf16.msk.msra.mxu0 %vm1860_vm4, %v2206_v10  ;;  %vm1864_vm12 = vmpackc.low %vm82_vm6, %vm81_vm5  ;;  %v2346_v16 = vadd.s32 64, %v2262_v1  ;;  %v2349_v17 = vadd.s32 72, %v2262_v1  ;;  %vm223_vm4 = vcmp.eq.s32.totalorder %v2311_v11, %v2287_v8  ;;  %v2377_v20 = vadd.s32 80, %v2262_v1 }
  0x30   :  { %1895 = vmatpush3.bf16.msk.msra.mxu1 %vm1892_vm9, %v2206_v10  ;;  %1865 = vmatprep.subr.msk.bf16.mxu0 %vm1864_vm12, %v2206_v10  ;;  %vm1896_vm15 = vmpackc.low %vm220_vm8, %vm219_vm7  ;;  %vm86_vm3 = vcmp.eq.s32.totalorder %v2314_v12, %v2282_v7  ;;  %vm224_vm5 = vcmp.eq.s32.totalorder %v2314_v12, %v2287_v8  ;;  %v2380_v21 = vadd.s32 88, %v2262_v1  ;;  %v2411_v24 = vadd.s32 96, %v2262_v1 }
  0x31   :  { %1897 = vmatprep.subr.msk.bf16.mxu1 %vm1896_vm15, %v2206_v10  ;;  %vm2333_vm0 = vmpackc.low %vm84_vm11, %vm83_vm10  ;;  %vm87_vm8 = vcmp.eq.s32.totalorder %v2346_v16, %v2282_v7  ;;  %vm88_vm9 = vcmp.eq.s32.totalorder %v2349_v17, %v2282_v7  ;;  %vm225_vm10 = vcmp.eq.s32.totalorder %v2346_v16, %v2287_v8  ;;  %vm226_vm11 = vcmp.eq.s32.totalorder %v2349_v17, %v2287_v8 }
  0x32   :  { %vm2337_vm1 = vmpackc.low %vm222_vm14, %vm221_vm13  ;;  %vm89_vm14 = vcmp.eq.s32.totalorder %v2377_v20, %v2282_v7  ;;  %v2414_v25 = vadd.s32 104, %v2262_v1  ;;  %v2445_v28 = vadd.s32 112, %v2262_v1  ;;  %v2448_v29 = vadd.s32 120, %v2262_v1 }
  0x33   :  { %1867 = vmatpush3.bf16.msk.msra.mxu0 %vm1864_vm12, %v2206_v10  ;;  %vm2364_vm6 = vmpackc.low %vm86_vm3, %vm85_vm2  ;;  %v3415_v58 = vmov 0  ;;  %v3419_v59 = vmov 0  ;;  %v3423_v60 = vmov 0  ;;  %v3427_v61 = vmov 0 }
  0x34   :  { %1899 = vmatpush3.bf16.msk.msra.mxu1 %vm1896_vm15, %v2206_v10  ;;  %1869 = vmatprep.subr.msk.bf16.mxu0 %vm2333_vm0, %v2206_v10  ;;  %vm2368_vm7 = vmpackc.low %vm224_vm5, %vm223_vm4  ;;  %vm90_vm15 = vcmp.eq.s32.totalorder %v2380_v21, %v2282_v7  ;;  %vm91_vm4 = vcmp.eq.s32.totalorder %v2411_v24, %v2282_v7  ;;  %vm92_vm5 = vcmp.eq.s32.totalorder %v2414_v25, %v2282_v7  ;;  %v3431_v62 = vmov 0 }
  0x35   :  { %1901 = vmatprep.subr.msk.bf16.mxu1 %vm2337_vm1, %v2206_v10  ;;  %vm2398_vm12 = vmpackc.low %vm88_vm9, %vm87_vm8  ;;  %v3435_v63 = vmov 0  ;;  %v3439_v0 = vmov 0  ;;  %v3447_v9 = vmov 0  ;;  %v3451_v14 = vmov 0 }
  0x36   :  { %vm2402_vm13 = vmpackc.low %vm226_vm11, %vm225_vm10  ;;  %vm93_vm10 = vcmp.eq.s32.totalorder %v2445_v28, %v2282_v7  ;;  %vm94_vm11 = vcmp.eq.s32.totalorder %v2448_v29, %v2282_v7  ;;  %v3443_v7 = vmov 0  ;;  %v3455_v15 = vmov 0 }
  0x37   :  { %1871 = vmatpush3.bf16.msk.msra.mxu0 %vm2333_vm0, %v2206_v10  ;;  %vm227_vm0 = vcmp.eq.s32.totalorder %v2377_v20, %v2287_v8  ;;  %vm2432_vm2 = vmpackc.low %vm90_vm15, %vm89_vm14  ;;  %vm380_vm14 = vcmp.eq.s32.totalorder %v2262_v1, %v2473_v31  ;;  %vm381_vm15 = vcmp.eq.s32.totalorder %v2265_v2, %v2473_v31  ;;  %v3463_v22 = vmov 0 }
  0x38   :  { %1903 = vmatpush3.bf16.msk.msra.mxu1 %vm2337_vm1, %v2206_v10  ;;  %1873 = vmatprep.subr.msk.bf16.mxu0 %vm2364_vm6, %v2206_v10  ;;  %vm228_vm1 = vcmp.eq.s32.totalorder %v2380_v21, %v2287_v8  ;;  %vm2466_vm8 = vmpackc.low %vm92_vm5, %vm91_vm4  ;;  %vm382_vm4 = vcmp.eq.s32.totalorder %v2268_v3, %v2473_v31  ;;  %vm383_vm5 = vcmp.eq.s32.totalorder %v2271_v4, %v2473_v31  ;;  %v3465_v23 = vmov 0 }
  0x39   :  { %1905 = vmatprep.subr.msk.bf16.mxu1 %vm2368_vm7, %v2206_v10  ;;  %vm2436_vm3 = vmpackc.low %vm228_vm1, %vm227_vm0  ;;  %vm545_vm1 = vcmp.eq.s32.totalorder %v2262_v1, %v2486_v33 }
  0x3a   :  { %vm2508_vm0 = vmpackc.low %vm94_vm11, %vm93_vm10  ;;  %vm548_vm10 = vcmp.eq.s32.totalorder %v2271_v4, %v2486_v33 }
  0x3b   :  { %1875 = vmatpush3.bf16.msk.msra.mxu0 %vm2364_vm6, %v2206_v10  ;;  %vm229_vm6 = vcmp.eq.s32.totalorder %v2411_v24, %v2287_v8 }
  0x3c   :  { %1907 = vmatpush3.bf16.msk.msra.mxu1 %vm2368_vm7, %v2206_v10  ;;  %1877 = vmatprep.subr.msk.bf16.mxu0 %vm2398_vm12, %v2206_v10  ;;  %vm230_vm7 = vcmp.eq.s32.totalorder %v2414_v25, %v2287_v8 }
  0x3d   :  { %1909 = vmatprep.subr.msk.bf16.mxu1 %vm2402_vm13, %v2206_v10  ;;  %vm2475_vm9 = vmpackc.low %vm230_vm7, %vm229_vm6  ;;  %vm547_vm7 = vcmp.eq.s32.totalorder %v2268_v3, %v2486_v33 }
  0x3e   :  { %vm2527_vm6 = vmpackc.low %vm381_vm15, %vm380_vm14  ;;  %vm550_vm14 = vcmp.eq.s32.totalorder %v2277_v6, %v2486_v33 }
  0x3f   :  { %1879 = vmatpush3.bf16.msk.msra.mxu0 %vm2398_vm12, %v2206_v10  ;;  %vm231_vm12 = vcmp.eq.s32.totalorder %v2445_v28, %v2287_v8  ;;  %vm2565_vm15 = vmpackc.low %vm548_vm10, %vm547_vm7  ;;  %vm552_vm7 = vcmp.eq.s32.totalorder %v2314_v12, %v2486_v33  ;;  %vm875_vm10 = vcmp.eq.s32.totalorder %v2262_v1, %v2552_v38 }
  0x40   :  { %1911 = vmatpush3.bf16.msk.msra.mxu1 %vm2402_vm13, %v2206_v10  ;;  %1881 = vmatprep.subr.msk.bf16.mxu0 %vm2432_vm2, %v2206_v10  ;;  %vm232_vm13 = vcmp.eq.s32.totalorder %v2448_v29, %v2287_v8  ;;  %v1420_v8 = vld [vmem:[%s3328_s4 + $0x4] ss:$0 sm:$0xff]  ;;  %s2207_s4 = smov [#allocation7]  }
  0x41   :  { %1913 = vmatprep.subr.msk.bf16.mxu1 %vm2436_vm3, %v2206_v10  ;;  %s1207_s29 = sshll.u32 %s2207_s4, 4  ;;  %s1208_s29 = int_to_ptr.vmem [resolvable:$true] %s1207_s29 }
  0x42   :  { %s2174_s30 = scalar_lea.vmem %s1208_s29, 16  ;;  %s2178_s6 = scalar_lea.vmem %s1208_s29, 32 }
  0x43   :  { %1883 = vmatpush3.bf16.msk.msra.mxu0 %vm2432_vm2, %v2206_v10  ;;  %vm546_vm2 = vcmp.eq.s32.totalorder %v2265_v2, %v2486_v33  ;;  %p2175_p2 = scmp.ne.s32.totalorder %s1208_s29, %s2174_s30  ;;  %p2179_p3 = scmp.lt.s32.totalorder %s1208_s29, %s1208_s29 }
  0x44   :  { %1915 = vmatpush3.bf16.msk.msra.mxu1 %vm2436_vm3, %v2206_v10  ;;  %1885 = vmatprep.subr.msk.bf16.mxu0 %vm2466_vm8, %v2206_v10  ;;  %vm2516_vm3 = vmpackc.low %vm232_vm13, %vm231_vm12  ;;  %vm385_vm12 = vcmp.eq.s32.totalorder %v2277_v6, %v2473_v31  ;;  %vm549_vm13 = vcmp.eq.s32.totalorder %v2274_v5, %v2486_v33  ;;  %p2180_p4 = scmp.lt.s32.totalorder %s2178_s6, %s2174_s30 }
  0x45   :  { %1917 = vmatprep.subr.msk.bf16.mxu1 %vm2475_vm9, %v2206_v10  ;;  %vm2541_vm11 = vmpackc.low %vm546_vm2, %vm545_vm1  ;;  %vm386_vm1 = vcmp.eq.s32.totalorder %v2311_v11, %v2473_v31  ;;  %vm387_vm2 = vcmp.eq.s32.totalorder %v2314_v12, %v2473_v31 }
  0x46   :  { %p2181_p5 = por %p2180_p4, %p2179_p3 }
  0x47   :  { %1887 = vmatpush3.bf16.msk.msra.mxu0 %vm2466_vm8, %v2206_v10  ;;  %vm384_vm8 = vcmp.eq.s32.totalorder %v2274_v5, %v2473_v31 }
  0x48   :  { %1919 = vmatpush3.bf16.msk.msra.mxu1 %vm2475_vm9, %v2206_v10  ;;  %1889 = vmatprep.subr.msk.bf16.mxu0 %vm2508_vm0, %v2206_v10  ;;  %vm2557_vm9 = vmpackc.low %vm383_vm5, %vm382_vm4  ;;  %vm551_vm5 = vcmp.eq.s32.totalorder %v2311_v11, %v2486_v33  ;;  %p2182_p6 = pnand %p2181_p5, %p2175_p2 }
  0x49   :  { %1921 = vmatprep.subr.msk.bf16.mxu1 %vm2516_vm3, %v2206_v10  ;;  %vm2576_vm4 = vmpackc.low %vm385_vm12, %vm384_vm8 }
  0x4a   :  { %vm2607_vm8 = vmpackc.low %vm550_vm14, %vm549_vm13  ;;  %vm3402_vm14 = vcmp.eq.s32.totalorder %v2346_v16, %v2473_v31 }
  0x4b   :  { %1891 = vmatpush3.bf16.msk.msra.mxu0 %vm2508_vm0, %v2206_v10  ;;  %vm876_vm0 = vcmp.eq.s32.totalorder %v2265_v2, %v2552_v38  ;;  %vm2624_vm13 = vmpackc.low %vm387_vm2, %vm386_vm1  ;;  %vm389_vm2 = vcmp.eq.s32.totalorder %v2349_v17, %v2473_v31 }
  0x4c   :  { %1923 = vmatpush3.bf16.msk.msra.mxu1 %vm2516_vm3, %v2206_v10  ;;  %1925 = vmatprep.subr.msk.bf16.mxu0 %vm2527_vm6, %v2206_v10  ;;  %vm877_vm3 = vcmp.eq.s32.totalorder %v2268_v3, %v2552_v38  ;;  %vm2642_vm1 = vmpackc.low %vm552_vm7, %vm551_vm5 }
  0x4d   :  { %1957 = vmatprep.subr.msk.bf16.mxu1 %vm2541_vm11, %v2206_v10  ;;  %vm2656_vm12 = vmpackc.low %vm876_vm0, %vm875_vm10  ;;  %vm3395_vm10 = vcmp.eq.s32.totalorder %v2268_v3, %v2587_v43  ;;  %vm3396_vm0 = vcmp.eq.s32.totalorder %v2271_v4, %v2587_v43 }
  0x4e   :  { %1627 = vmatmul.mubr.f32.vlgmr.msra.gmra.mrb[0].mxu0 %v50_v41  ;;  %v3394_v50 = vsel %vm2656_vm12, 4294967295, %v3393_v50  ;;  %vm2676_vm5 = vmpackc.low %vm3396_vm0, %vm3395_vm10  ;;  %vm3399_vm10 = vcmp.eq.s32.totalorder %v2271_v4, %v2552_v38 }
  0x4f   :  { %1665 = vmatmul.mubr.f32.vlgmr.msra.gmra.mrb[0].mxu1 %v2596_v44  ;;  %1927 = vmatpush3.bf16.msk.msra.mxu0 %vm2527_vm6, %v2206_v10  ;;  %v3398_v52 = vsel %vm2676_vm5, 4294967295, %v3397_v52  ;;  %vm2697_vm0 = vmpackc.low %vm3399_vm10, %vm877_vm3  ;;  %vm3406_vm6 = vcmp.eq.s32.totalorder %v2277_v6, %v2587_v43 }
  0x50   :  { %1959 = vmatpush3.bf16.msk.msra.mxu1 %vm2541_vm11, %v2206_v10  ;;  %1629 = vmatprep.mubr.f32.mxu0 %v51_v46  ;;  %v3401_v54 = vsel %vm2697_vm0, 4294967295, %v3400_v54  ;;  %vm2715_vm3 = vmpackc.low %vm389_vm2, %vm3402_vm14  ;;  %vm3405_vm11 = vcmp.eq.s32.totalorder %v2274_v5, %v2587_v43  ;;  %vm3409_vm2 = vcmp.eq.s32.totalorder %v2346_v16, %v2486_v33  ;;  %vm3413_vm14 = vcmp.eq.s32.totalorder %v2274_v5, %v2552_v38 }
  0x51   :  { %1667 = vmatprep.mubr.f32.mxu1 %v2634_v48  ;;  %1929 = vmatprep.subr.msk.bf16.mxu0 %vm2557_vm9, %v2206_v10  ;;  %vm2727_vm7 = vmpackc.low %vm3406_vm6, %vm3405_vm11  ;;  %vm3410_vm6 = vcmp.eq.s32.totalorder %v2349_v17, %v2486_v33  ;;  %vm3414_vm0 = vcmp.eq.s32.totalorder %v2277_v6, %v2552_v38 }
  0x52   :  { %v3408_v56 = vsel %vm2727_vm7, 4294967295, %v3407_v56  ;;  %1630 = vmatmul.mubr.f32.gmra.mrb[2].mxu0 %v52_v51  ;;  %1961 = vmatprep.subr.msk.bf16.mxu1 %vm2565_vm15, %v2206_v10  ;;  %vm2744_vm11 = vmpackc.low %vm3410_vm6, %vm3409_vm2  ;;  %vm3425_vm2 = vcmp.eq.s32.totalorder %v2377_v20, %v2473_v31  ;;  %vm3426_vm6 = vcmp.eq.s32.totalorder %v2380_v21, %v2473_v31 }
  0x53   :  { %v3412_v57 = vsel %vm2744_vm11, 4294967295, %v3411_v57  ;;  %vm2756_vm7 = vmpackc.low %vm3414_vm0, %vm3413_vm14  ;;  %1668 = vmatmul.mubr.f32.gmra.mrb[2].mxu1 %v2687_v53  ;;  %1931 = vmatpush3.bf16.msk.msra.mxu0 %vm2557_vm9, %v2206_v10  ;;  %vm3417_vm0 = vcmp.eq.s32.totalorder %v2311_v11, %v2587_v43  ;;  %vm3418_vm14 = vcmp.eq.s32.totalorder %v2314_v12, %v2587_v43  ;;  %vm3421_vm9 = vcmp.eq.s32.totalorder %v2311_v11, %v2552_v38 }
  0x54   :  { %v3416_v58 = vsel %vm2756_vm7, 4294967295, %v3415_v58  ;;  %vm2776_vm10 = vmpackc.low %vm3418_vm14, %vm3417_vm0  ;;  %1963 = vmatpush3.bf16.msk.msra.mxu1 %vm2565_vm15, %v2206_v10  ;;  %1933 = vmatprep.subr.msk.bf16.mxu0 %vm2576_vm4, %v2206_v10  ;;  %vm3422_vm0 = vcmp.eq.s32.totalorder %v2314_v12, %v2552_v38  ;;  %vm3430_vm15 = vcmp.eq.s32.totalorder %v2349_v17, %v2587_v43 }
  0x55   :  { %v3420_v59 = vsel %vm2776_vm10, 4294967295, %v3419_v59  ;;  %vm2796_vm14 = vmpackc.low %vm3422_vm0, %vm3421_vm9  ;;  %1965 = vmatprep.subr.msk.bf16.mxu1 %vm2607_vm8, %v2206_v10  ;;  %1702 = vmatprep.mubr.f32.mxu0 %v2322_v13  ;;  %vm3429_vm0 = vcmp.eq.s32.totalorder %v2346_v16, %v2587_v43  ;;  %vm3434_vm10 = vcmp.eq.s32.totalorder %v2380_v21, %v2486_v33 }
  0x56   :  { %v3424_v60 = vsel %vm2796_vm14, 4294967295, %v3423_v60  ;;  %vm2813_vm9 = vmpackc.low %vm3426_vm6, %vm3425_vm2  ;;  %vm3433_vm6 = vcmp.eq.s32.totalorder %v2377_v20, %v2486_v33  ;;  %1740 = vmatprep.mubr.f32.mxu1 %v2322_v13  ;;  %vm3437_vm2 = vcmp.eq.s32.totalorder %v2346_v16, %v2552_v38  ;;  %vm3438_vm14 = vcmp.eq.s32.totalorder %v2349_v17, %v2552_v38 }
  0x57   :  { %v3428_v61 = vsel %vm2813_vm9, 4294967295, %v3427_v61  ;;  %vm2824_vm5 = vmpackc.low %vm3430_vm15, %vm3429_vm0  ;;  %1935 = vmatpush3.bf16.msk.msra.mxu0 %vm2576_vm4, %v2206_v10  ;;  %vm888_vm4 = vcmp.eq.s32.totalorder %v2414_v25, %v2552_v38  ;;  %vm724_vm0 = vcmp.eq.s32.totalorder %v2445_v28, %v2587_v43  ;;  %vm890_vm9 = vcmp.eq.s32.totalorder %v2448_v29, %v2552_v38 }
  0x58   :  { %v3432_v62 = vsel %vm2824_vm5, 4294967295, %v3431_v62  ;;  %vm2838_vm7 = vmpackc.low %vm3434_vm10, %vm3433_vm6  ;;  %vm887_vm6 = vcmp.eq.s32.totalorder %v2411_v24, %v2552_v38  ;;  %1967 = vmatpush3.bf16.msk.msra.mxu1 %vm2607_vm8, %v2206_v10  ;;  %1937 = vmatprep.subr.msk.bf16.mxu0 %vm2624_vm13, %v2206_v10  ;;  %vm725_vm8 = vcmp.eq.s32.totalorder %v2448_v29, %v2587_v43 }
  0x59   :  { %v3436_v63 = vsel %vm2838_vm7, 4294967295, %v3435_v63  ;;  %vm2853_vm5 = vmpackc.low %vm3438_vm14, %vm3437_vm2  ;;  %vm3441_vm14 = vcmp.eq.s32.totalorder %v2377_v20, %v2587_v43  ;;  %vm3442_vm2 = vcmp.eq.s32.totalorder %v2380_v21, %v2587_v43  ;;  %1969 = vmatprep.subr.msk.bf16.mxu1 %vm2642_vm1, %v2206_v10  ;;  %vm889_vm7 = vcmp.eq.s32.totalorder %v2445_v28, %v2552_v38 }
  0x5a   :  { %v3440_v0 = vsel %vm2853_vm5, 4294967295, %v3439_v0  ;;  %vm2874_vm10 = vmpackc.low %vm3442_vm2, %vm3441_vm14  ;;  %vm3445_vm14 = vcmp.eq.s32.totalorder %v2377_v20, %v2552_v38  ;;  %vm3446_vm2 = vcmp.eq.s32.totalorder %v2380_v21, %v2552_v38  ;;  %vm3450_vm5 = vcmp.eq.s32.totalorder %v2414_v25, %v2473_v31 }
  0x5b   :  { %v3444_v7 = vsel %vm2874_vm10, 4294967295, %v3443_v7  ;;  %vm2897_vm15 = vmpackc.low %vm3446_vm2, %vm3445_vm14  ;;  %vm3449_vm10 = vcmp.eq.s32.totalorder %v2411_v24, %v2473_v31  ;;  %vm3453_vm2 = vcmp.eq.s32.totalorder %v2411_v24, %v2587_v43  ;;  %1939 = vmatpush3.bf16.msk.msra.mxu0 %vm2624_vm13, %v2206_v10  ;;  %vm1044_vm13 = vcmp.eq.s32.totalorder %v2274_v5, %v1420_v8 }
  0x5c   :  { %v3448_v9 = vsel %vm2897_vm15, 4294967295, %v3447_v9  ;;  %vm2914_vm14 = vmpackc.low %vm3450_vm5, %vm3449_vm10  ;;  %vm3454_vm15 = vcmp.eq.s32.totalorder %v2414_v25, %v2587_v43  ;;  %vm3457_vm5 = vcmp.eq.s32.totalorder %v2411_v24, %v2486_v33  ;;  %vm3458_vm10 = vcmp.eq.s32.totalorder %v2414_v25, %v2486_v33  ;;  %1971 = vmatpush3.bf16.msk.msra.mxu1 %vm2642_vm1, %v2206_v10  ;;  %1941 = vmatprep.subr.msk.bf16.mxu0 %vm2715_vm3, %v2206_v10 }
  0x5d   :  { %v3452_v14 = vsel %vm2914_vm14, 4294967295, %v3451_v14  ;;  %vm2924_vm12 = vmpackc.low %vm3454_vm15, %vm3453_vm2  ;;  %vm1040_vm2 = vcmp.eq.s32.totalorder %v2262_v1, %v1420_v8  ;;  %vm1046_vm1 = vcmp.eq.s32.totalorder %v2311_v11, %v1420_v8  ;;  %v3472_v5 = vmov 0 }
  0x5e   :  { %v3456_v15 = vsel %vm2924_vm12, 4294967295, %v3455_v15  ;;  %vm2938_vm14 = vmpackc.low %vm3458_vm10, %vm3457_vm5  ;;  %vm1041_vm12 = vcmp.eq.s32.totalorder %v2265_v2, %v1420_v8  ;;  %vm1042_vm5 = vcmp.eq.s32.totalorder %v2268_v3, %v1420_v8  ;;  %vm1043_vm10 = vcmp.eq.s32.totalorder %v2271_v4, %v1420_v8 }
  0x5f   :  { %vm2942_vm15 = vmpackc.low %vm888_vm4, %vm887_vm6  ;;  %vm3467_vm4 = vnez %v3412_v57  ;;  %v3468_v3 = vmov 0  ;;  %v3470_v4 = vmov 0  ;;  %1943 = vmatpush3.bf16.msk.msra.mxu0 %vm2715_vm3, %v2206_v10  ;;  %vm1052_vm3 = vcmp.eq.s32.totalorder %v2411_v24, %v1420_v8 }
  0x60   :  { %vm2951_vm11 = vmpackc.low %vm725_vm8, %vm724_vm0  ;;  %vm1045_vm0 = vcmp.eq.s32.totalorder %v2277_v6, %v1420_v8  ;;  %1973 = vmatprep.subr.msk.bf16.mxu1 %vm3467_vm4, %v2206_v10  ;;  %v3475_v6 = vmov 0  ;;  %v3478_v11 = vmov 0 }
  0x61   :  { %v3464_v22 = vsel %vm2951_vm11, 4294967295, %v3463_v22  ;;  %vm2963_vm6 = vmpackc.low %vm890_vm9, %vm889_vm7  ;;  %vm1047_vm11 = vcmp.eq.s32.totalorder %v2314_v12, %v1420_v8  ;;  %vm1048_vm9 = vcmp.eq.s32.totalorder %v2346_v16, %v1420_v8  ;;  %1975 = vmatpush3.bf16.msk.msra.mxu1 %vm3467_vm4, %v2206_v10  ;;  %vm1054_vm4 = vcmp.eq.s32.totalorder %v2445_v28, %v1420_v8 }
  0x62   :  { %v3466_v23 = vsel %vm2963_vm6, 4294967295, %v3465_v23  ;;  %vm2972_vm8 = vmpackc.low %vm1041_vm12, %vm1040_vm2  ;;  %vm1049_vm6 = vcmp.eq.s32.totalorder %v2349_v17, %v1420_v8  ;;  %vm1050_vm2 = vcmp.eq.s32.totalorder %v2377_v20, %v1420_v8 }
  0x63   :  { %v3469_v3 = vsel %vm2972_vm8, 4294967295, %v3468_v3  ;;  %vm2978_vm7 = vmpackc.low %vm1043_vm10, %vm1042_vm5  ;;  %vm1051_vm8 = vcmp.eq.s32.totalorder %v2380_v21, %v1420_v8  ;;  %vm3474_vm5 = vnez %v3428_v61 }
  0x64   :  { %v3471_v4 = vsel %vm2978_vm7, 4294967295, %v3470_v4  ;;  %vm2987_vm12 = vmpackc.low %vm1045_vm0, %vm1044_vm13  ;;  %1945 = vmatprep.subr.msk.bf16.mxu0 %vm3474_vm5, %v2206_v10  ;;  %vm1053_vm13 = vcmp.eq.s32.totalorder %v2414_v25, %v1420_v8  ;;  %vm3477_vm0 = vnez %v3436_v63  ;;  %vm1055_vm7 = vcmp.eq.s32.totalorder %v2448_v29, %v1420_v8 }
  0x65   :  { %v3473_v5 = vsel %vm2987_vm12, 4294967295, %v3472_v5  ;;  %vm2999_vm10 = vmpackc.low %vm1047_vm11, %vm1046_vm1  ;;  %1977 = vmatprep.subr.msk.bf16.mxu1 %vm3477_vm0, %v2206_v10  ;;  %vm394_vm11 = vcmp.eq.s32.totalorder %v2445_v28, %v2473_v31  ;;  %vm395_vm1 = vcmp.eq.s32.totalorder %v2448_v29, %v2473_v31  ;;  %1947 = vmatpush3.bf16.msk.msra.mxu0 %vm3474_vm5, %v2206_v10 }
  0x66   :  { %v3476_v6 = vsel %vm2999_vm10, 4294967295, %v3475_v6  ;;  %vm3008_vm12 = vmpackc.low %vm1049_vm6, %vm1048_vm9  ;;  %vm559_vm6 = vcmp.eq.s32.totalorder %v2445_v28, %v2486_v33  ;;  %vm560_vm9 = vcmp.eq.s32.totalorder %v2448_v29, %v2486_v33  ;;  %1979 = vmatpush3.bf16.msk.msra.mxu1 %vm3477_vm0, %v2206_v10  ;;  %vm711_vm0 = vcmp.eq.s32.totalorder %v2265_v2, %v2587_v43 }
  0x67   :  { %v3479_v11 = vsel %vm3008_vm12, 4294967295, %v3478_v11  ;;  %vm3018_vm10 = vmpackc.low %vm1051_vm8, %vm1050_vm2  ;;  %vm3484_vm8 = vnez %v3452_v14  ;;  %1981 = vmatprep.subr.msk.bf16.mxu1 %vm2938_vm14, %v2206_v10 }
  0x68   :  { %vm3029_vm12 = vmpackc.low %vm1053_vm13, %vm1052_vm3  ;;  %1949 = vmatprep.subr.msk.bf16.mxu0 %vm3484_vm8, %v2206_v10  ;;  %vm710_vm13 = vcmp.eq.s32.totalorder %v2262_v1, %v2587_v43 }
  0x69   :  { %vm3039_vm2 = vmpackc.low %vm1055_vm7, %vm1054_vm4  ;;  %1951 = vmatpush3.bf16.msk.msra.mxu0 %vm3484_vm8, %v2206_v10  ;;  %vm3487_vm4 = vnez %v3394_v50  ;;  %vm3493_vm8 = vnez %v3424_v60 }
  0x6a   :  { %vm1952_vm5 = vmpackc.low %vm395_vm1, %vm394_vm11  ;;  %1983 = vmatpush3.bf16.msk.msra.mxu1 %vm2938_vm14, %v2206_v10  ;;  %vm3488_vm14 = vnez %v3398_v52  ;;  %vm3489_vm11 = vnez %v3401_v54  ;;  %vm3490_vm1 = vnez %v3408_v56 }
  0x6b   :  { %vm1984_vm3 = vmpackc.low %vm560_vm9, %vm559_vm6  ;;  %1953 = vmatprep.subr.msk.bf16.mxu0 %vm1952_vm5, %v2206_v10  ;;  %vm3491_vm6 = vnez %v3416_v58  ;;  %vm3492_vm9 = vnez %v3420_v59 }
  0x6c   :  { %1985 = vmatprep.subr.msk.bf16.mxu1 %vm1984_vm3, %v2206_v10  ;;  %vm1988_vm7 = vmpackc.low %vm711_vm0, %vm710_vm13  ;;  %vm3496_vm13 = vnez %v3444_v7  ;;  %vm3497_vm0 = vnez %v3448_v9 }
  0x6d   :  { %1955 = vmatpush3.bf16.msk.msra.mxu0 %vm1952_vm5, %v2206_v10  ;;  %vm3494_vm5 = vnez %v3432_v62 }
  0x6e   :  { %1987 = vmatpush3.bf16.msk.msra.mxu1 %vm1984_vm3, %v2206_v10  ;;  %1989 = vmatprep.subr.msk.bf16.mxu0 %vm1988_vm7, %v2206_v10  ;;  %vm3495_vm3 = vnez %v3440_v0 }
  0x6f   :  { %2021 = vmatprep.subr.msk.bf16.mxu1 %vm3487_vm4, %v2206_v10 }
  0x70   :  { %1703 = vmatmul.mubr.f32.vlgmr.msra.gmra.mrb[4].mxu0 %v2596_v44 }
  0x71   :  { %1741 = vmatmul.mubr.f32.vlgmr.msra.gmra.mrb[4].mxu1 %v2596_v44  ;;  %1991 = vmatpush3.bf16.msk.msra.mxu0 %vm1988_vm7, %v2206_v10  ;;  %vm3498_vm7 = vnez %v3456_v15 }
  0x72   :  { %2023 = vmatpush3.bf16.msk.msra.mxu1 %vm3487_vm4, %v2206_v10  ;;  %1705 = vmatprep.mubr.f32.mxu0 %v2634_v48  ;;  %vm3499_vm4 = vnez %v3464_v22 }
  0x73   :  { %1743 = vmatprep.mubr.f32.mxu1 %v2634_v48  ;;  %1993 = vmatprep.subr.msk.bf16.mxu0 %vm3488_vm14, %v2206_v10 }
  0x74   :  { %1706 = vmatmul.mubr.f32.gmra.mrb[6].mxu0 %v2687_v53  ;;  %2025 = vmatprep.subr.msk.bf16.mxu1 %vm3489_vm11, %v2206_v10 }
  0x75   :  { %1744 = vmatmul.mubr.f32.gmra.mrb[6].mxu1 %v2687_v53  ;;  %1995 = vmatpush3.bf16.msk.msra.mxu0 %vm3488_vm14, %v2206_v10  ;;  %vm3500_vm14 = vnez %v3466_v23 }
  0x76   :  { %2027 = vmatpush3.bf16.msk.msra.mxu1 %vm3489_vm11, %v2206_v10  ;;  %1997 = vmatprep.subr.msk.bf16.mxu0 %vm3490_vm1, %v2206_v10  ;;  %vm3501_vm11 = vnez %v3469_v3 }
  0x77   :  { %2029 = vmatprep.subr.msk.bf16.mxu1 %vm3491_vm6, %v2206_v10  ;;  %1778 = vmatprep.mubr.f32.mxu0 %v2322_v13 }
  0x78   :  { %1816 = vmatprep.mubr.f32.mxu1 %v2322_v13 }
  0x79   :  { %1999 = vmatpush3.bf16.msk.msra.mxu0 %vm3490_vm1, %v2206_v10  ;;  %vm3503_vm1 = vnez %v3473_v5 }
  0x7a   :  { %2031 = vmatpush3.bf16.msk.msra.mxu1 %vm3491_vm6, %v2206_v10  ;;  %2001 = vmatprep.subr.msk.bf16.mxu0 %vm3492_vm9, %v2206_v10  ;;  %vm3504_vm6 = vnez %v3476_v6 }
  0x7b   :  { %2033 = vmatprep.subr.msk.bf16.mxu1 %vm3493_vm8, %v2206_v10 }
  0x7d   :  { %2003 = vmatpush3.bf16.msk.msra.mxu0 %vm3492_vm9, %v2206_v10  ;;  %vm3505_vm9 = vnez %v3479_v11 }
  0x7e   :  { %2035 = vmatpush3.bf16.msk.msra.mxu1 %vm3493_vm8, %v2206_v10  ;;  %2005 = vmatprep.subr.msk.bf16.mxu0 %vm3494_vm5, %v2206_v10 }
  0x7f   :  { %2037 = vmatprep.subr.msk.bf16.mxu1 %vm3495_vm3, %v2206_v10 }
  0x81   :  { %2007 = vmatpush3.bf16.msk.msra.mxu0 %vm3494_vm5, %v2206_v10 }
  0x82   :  { %2039 = vmatpush3.bf16.msk.msra.mxu1 %vm3495_vm3, %v2206_v10  ;;  %2009 = vmatprep.subr.msk.bf16.mxu0 %vm3496_vm13, %v2206_v10 }
  0x83   :  { %2041 = vmatprep.subr.msk.bf16.mxu1 %vm3497_vm0, %v2206_v10 }
  0x85   :  { %2011 = vmatpush3.bf16.msk.msra.mxu0 %vm3496_vm13, %v2206_v10 }
  0x86   :  { %2043 = vmatpush3.bf16.msk.msra.mxu1 %vm3497_vm0, %v2206_v10  ;;  %2013 = vmatprep.subr.msk.bf16.mxu0 %vm3498_vm7, %v2206_v10 }
  0x87   :  { %2045 = vmatprep.subr.msk.bf16.mxu1 %vm2942_vm15, %v2206_v10 }
  0x89   :  { %2015 = vmatpush3.bf16.msk.msra.mxu0 %vm3498_vm7, %v2206_v10 }
  0x8a   :  { %2047 = vmatpush3.bf16.msk.msra.mxu1 %vm2942_vm15, %v2206_v10  ;;  %2017 = vmatprep.subr.msk.bf16.mxu0 %vm3499_vm4, %v2206_v10  ;;  %vm3502_vm15 = vnez %v3471_v4 }
  0x8b   :  { %2049 = vmatprep.subr.msk.bf16.mxu1 %vm3500_vm14, %v2206_v10 }
  0x8d   :  { %2019 = vmatpush3.bf16.msk.msra.mxu0 %vm3499_vm4, %v2206_v10 }
  0x8e   :  { %2051 = vmatpush3.bf16.msk.msra.mxu1 %vm3500_vm14, %v2206_v10  ;;  %2053 = vmatprep.subr.msk.bf16.mxu0 %vm3501_vm11, %v2206_v10 }
  0x8f   :  { %2084 = vmatprep.subr.msk.bf16.mxu1 %vm3501_vm11, %v2206_v10 }
  0x90   :  { %1779 = vmatmul.mubr.f32.vlgmr.msra.gmra.mrb[8].mxu0 %v2596_v44 }
  0x91   :  { %1817 = vmatmul.mubr.f32.vlgmr.msra.gmra.mrb[8].mxu1 %v2596_v44  ;;  %2055 = vmatpush3.bf16.msk.msra.mxu0 %vm3501_vm11, %v2206_v10 }
  0x92   :  { %2092 = vmatpush3.bf16.msk.msra.mxu1 %vm3501_vm11, %v2206_v10  ;;  %1781 = vmatprep.mubr.f32.mxu0 %v2634_v48 }
  0x93   :  { %1819 = vmatprep.mubr.f32.mxu1 %v2634_v48  ;;  %2057 = vmatprep.subr.msk.bf16.mxu0 %vm3502_vm15, %v2206_v10 }
  0x94   :  { %1782 = vmatmul.mubr.f32.gmra.mrb[10].mxu0 %v2687_v53  ;;  %2085 = vmatprep.subr.msk.bf16.mxu1 %vm3502_vm15, %v2206_v10 }
  0x95   :  { %1820 = vmatmul.mubr.f32.gmra.mrb[10].mxu1 %v2687_v53  ;;  %2059 = vmatpush3.bf16.msk.msra.mxu0 %vm3502_vm15, %v2206_v10 }
  0x96   :  { %2093 = vmatpush3.bf16.msk.msra.mxu1 %vm3502_vm15, %v2206_v10  ;;  %2061 = vmatprep.subr.msk.bf16.mxu0 %vm3503_vm1, %v2206_v10 }
  0x97   :  { %2086 = vmatprep.subr.msk.bf16.mxu1 %vm3503_vm1, %v2206_v10  ;;  %1854 = vmatprep.mubr.f32.mxu0 %v2322_v13 }
  0x98   :  { %1857 = vmatprep.mubr.f32.mxu1 %v2634_v48 }
  0x99   :  { %2063 = vmatpush3.bf16.msk.msra.mxu0 %vm3503_vm1, %v2206_v10 }
  0x9a   :  { %2094 = vmatpush3.bf16.msk.msra.mxu1 %vm3503_vm1, %v2206_v10  ;;  %2065 = vmatprep.subr.msk.bf16.mxu0 %vm3504_vm6, %v2206_v10 }
  0x9b   :  { %2087 = vmatprep.subr.msk.bf16.mxu1 %vm3504_vm6, %v2206_v10 }
  0x9d   :  { %2067 = vmatpush3.bf16.msk.msra.mxu0 %vm3504_vm6, %v2206_v10 }
  0x9e   :  { %2095 = vmatpush3.bf16.msk.msra.mxu1 %vm3504_vm6, %v2206_v10  ;;  %2069 = vmatprep.subr.msk.bf16.mxu0 %vm3505_vm9, %v2206_v10 }
  0x9f   :  { %2088 = vmatprep.subr.msk.bf16.mxu1 %vm3505_vm9, %v2206_v10 }
  0xa1   :  { %2071 = vmatpush3.bf16.msk.msra.mxu0 %vm3505_vm9, %v2206_v10 }
  0xa2   :  { %2096 = vmatpush3.bf16.msk.msra.mxu1 %vm3505_vm9, %v2206_v10  ;;  %2073 = vmatprep.subr.msk.bf16.mxu0 %vm3018_vm10, %v2206_v10 }
  0xa3   :  { %2089 = vmatprep.subr.msk.bf16.mxu1 %vm3018_vm10, %v2206_v10 }
  0xa5   :  { %2075 = vmatpush3.bf16.msk.msra.mxu0 %vm3018_vm10, %v2206_v10 }
  0xa6   :  { %2097 = vmatpush3.bf16.msk.msra.mxu1 %vm3018_vm10, %v2206_v10  ;;  %2077 = vmatprep.subr.msk.bf16.mxu0 %vm3029_vm12, %v2206_v10 }
  0xa7   :  { %2090 = vmatprep.subr.msk.bf16.mxu1 %vm3029_vm12, %v2206_v10 }
  0xa9   :  { %2079 = vmatpush3.bf16.msk.msra.mxu0 %vm3029_vm12, %v2206_v10 }
  0xaa   :  { %2098 = vmatpush3.bf16.msk.msra.mxu1 %vm3029_vm12, %v2206_v10  ;;  %2081 = vmatprep.subr.msk.bf16.mxu0 %vm3039_vm2, %v2206_v10 }
  0xab   :  { %2091 = vmatprep.subr.msk.bf16.mxu1 %vm3039_vm2, %v2206_v10 }
  0xad   :  { %2083 = vmatpush3.bf16.msk.msra.mxu0 %vm3039_vm2, %v2206_v10 }
  0xae   :  { %2099 = vmatpush3.bf16.msk.msra.mxu1 %vm3039_vm2, %v2206_v10 }
  0xb0   :  { %1855 = vmatmul.mubr.f32.vlgmr.msra.gmra.mrb[12].mxu0 %v2596_v44 }
  0xb1   :  { %1858 = vmatmul.mubr.f32.vlgmr.msra.gmra.mrb[12].mxu1 %v2687_v53 }
 0x121   :  { %v3266_v1 = vpop.f32.mrb[0].mxu0 }
 0x122   :  { %v1666_v2 = vpop.f32.mrb[0].mxu1  ;;  %v3268_v13 = vpop.f32.mrb[1].mxu0 }
 0x123   :  { %v351_v20 = vmul.f32 %v1666_v2, %v3266_v1  ;;  %v331_v21 = vpop.f32.mrb[1].mxu1 }
 0x124   :  { %v350_v24 = vmul.f32 %v331_v21, %v3268_v13 }
 0x125   :  { %v3272_v25 = vpop.f32.mrb[2].mxu0 }
 0x126   :  { %v354_v26 = vadd.f32 %v351_v20, %v350_v24  ;;  %v1669_v27 = vpop.f32.mrb[2].mxu1  ;;  %v3274_v28 = vpop.f32.mrb[3].mxu0 }
 0x127   :  { %v353_v10 = vmul.f32 %v1669_v27, %v3272_v25  ;;  %v341_v29 = vpop.f32.mrb[3].mxu1 }
 0x128   :  { %v352_v30 = vmul.f32 %v341_v29, %v3274_v28 }
 0x12a   :  { %v355_v31 = vadd.f32 %v354_v26, %v352_v30 }
 0x12c   :  { %v356_v32 = vadd.f32 %v355_v31, %v353_v10 }
 0x12e   :  { %v357_v33 = vrot.slane %v356_v32, 4 }
 0x130   :  { %v358_v34 = vadd.f32 %v357_v33, %v356_v32 }
 0x132   :  { %v359_v35 = vrot.slane %v358_v34, 2 }
 0x134   :  { %v360_v36 = vadd.f32 %v359_v35, %v358_v34 }
 0x136   :  { %v361_v37 = vrot.slane %v360_v36, 1 }
 0x138   :  { %v362_v46 = vadd.f32 %v361_v37, %v360_v36 }
 0x13a   :  { %v1283_v57 = vclamps-f32 %v362_v46, 4.0 }
 0x13c   :  { %v3286_v62 = vsub.f32 0.0, %v1283_v57 }
 0x13e   :  { %v367_v9 = vand.u32 2147483647, %v3286_v62 }
 0x140   :  { %v368_v22 = vsub.f32 0.0, %v367_v9 }
 0x142   :  { %v369_v6 = vmul.f32 1.442695, %v368_v22 }
 0x143   :  { %v1704_v38 = vpop.f32.mrb[4].mxu0 }
 0x144   :  { %v514_v39 = vmul.f32 %v1704_v38, %v3266_v1  ;;  %v1742_v40 = vpop.f32.mrb[4].mxu1  ;;  %v494_v41 = vpop.f32.mrb[5].mxu0  ;;  %2106 = vpow2.f32 %v369_v6 }
 0x145   :  { %v679_v42 = vmul.f32 %v1742_v40, %v3266_v1  ;;  %v513_v43 = vmul.f32 %v494_v41, %v3268_v13  ;;  %v659_v44 = vpop.f32.mrb[5].mxu1 }
 0x146   :  { %v678_v45 = vmul.f32 %v659_v44, %v3268_v13 }
 0x147   :  { %v517_v47 = vadd.f32 %v514_v39, %v513_v43  ;;  %v1707_v48 = vpop.f32.mrb[6].mxu0 }
 0x148   :  { %v682_v49 = vadd.f32 %v679_v42, %v678_v45  ;;  %v516_v50 = vmul.f32 %v1707_v48, %v3272_v25  ;;  %v1745_v51 = vpop.f32.mrb[6].mxu1  ;;  %v504_v52 = vpop.f32.mrb[7].mxu0 }
 0x149   :  { %v681_v53 = vmul.f32 %v1745_v51, %v3272_v25  ;;  %v515_v54 = vmul.f32 %v504_v52, %v3274_v28  ;;  %v669_v55 = vpop.f32.mrb[7].mxu1 }
 0x14a   :  { %v680_v56 = vmul.f32 %v669_v55, %v3274_v28 }
 0x14b   :  { %v518_v58 = vadd.f32 %v517_v47, %v515_v54 }
 0x14c   :  { %v683_v59 = vadd.f32 %v682_v49, %v680_v56 }
 0x14d   :  { %v519_v60 = vadd.f32 %v518_v58, %v516_v50 }
 0x14e   :  { %v684_v61 = vadd.f32 %v683_v59, %v681_v53  ;;  %v2107_v44 = vpop.eup %2106 }
 0x14f   :  { %v520_v63 = vrot.slane %v519_v60, 4  ;;  %v371_v50 = vadd.f32 1.0, %v2107_v44 }
 0x150   :  { %v685_v0 = vrot.slane %v684_v61, 4 }
 0x151   :  { %v521_v7 = vadd.f32 %v520_v63, %v519_v60 }
 0x152   :  { %v686_v8 = vadd.f32 %v685_v0, %v684_v61 }
 0x153   :  { %v522_v14 = vrot.slane %v521_v7, 2 }
 0x154   :  { %v687_v15 = vrot.slane %v686_v8, 2 }
 0x155   :  { %v523_v18 = vadd.f32 %v522_v14, %v521_v7 }
 0x156   :  { %v688_v19 = vadd.f32 %v687_v15, %v686_v8 }
 0x157   :  { %v524_v23 = vrot.slane %v523_v18, 1 }
 0x158   :  { %v689_v3 = vrot.slane %v688_v19, 1 }
 0x159   :  { %v525_v4 = vadd.f32 %v524_v23, %v523_v18 }
 0x15a   :  { %v690_v5 = vadd.f32 %v689_v3, %v688_v19 }
 0x15b   :  { %v1317_v11 = vclamps-f32 %v525_v4, 4.0 }
 0x15c   :  { %v1351_v12 = vclamps-f32 %v690_v5, 4.0 }
 0x15d   :  { %v3289_v16 = vsub.f32 0.0, %v1317_v11 }
 0x15e   :  { %v3291_v17 = vsub.f32 0.0, %v1351_v12  ;;  %v366_v12 = vmax.f32 %v3286_v62, 0.0 }
 0x15f   :  { %v529_v2 = vsub.f32 0.0, %v3289_v16 }
 0x160   :  { %v694_v20 = vsub.f32 0.0, %v3291_v17 }
 0x161   :  { %v531_v21 = vand.u32 2147483647, %v529_v2  ;;  %v530_v16 = vmax.f32 %v529_v2, 0.0 }
 0x162   :  { %v696_v24 = vand.u32 2147483647, %v694_v20 }
 0x163   :  { %v532_v26 = vsub.f32 0.0, %v531_v21  ;;  %v1780_v27 = vpop.f32.mrb[8].mxu0 }
 0x164   :  { %v697_v10 = vsub.f32 0.0, %v696_v24  ;;  %v844_v29 = vmul.f32 %v1780_v27, %v3266_v1  ;;  %v1818_v30 = vpop.f32.mrb[8].mxu1  ;;  %v824_v31 = vpop.f32.mrb[9].mxu0 }
 0x165   :  { %v533_v32 = vmul.f32 1.442695, %v532_v26  ;;  %v1009_v33 = vmul.f32 %v1818_v30, %v3266_v1  ;;  %v843_v34 = vmul.f32 %v824_v31, %v3268_v13  ;;  %v989_v35 = vpop.f32.mrb[9].mxu1  ;;  %v695_v31 = vmax.f32 %v694_v20, 0.0 }
 0x166   :  { %v698_v36 = vmul.f32 1.442695, %v697_v10  ;;  %v1008_v37 = vmul.f32 %v989_v35, %v3268_v13 }
 0x167   :  { %2108 = vpow2.f32 %v533_v32  ;;  %v847_v38 = vadd.f32 %v844_v29, %v843_v34  ;;  %v1783_v39 = vpop.f32.mrb[10].mxu0 }
 0x168   :  { %2110 = vpow2.f32 %v698_v36  ;;  %v1012_v40 = vadd.f32 %v1009_v33, %v1008_v37  ;;  %v846_v41 = vmul.f32 %v1783_v39, %v3272_v25  ;;  %v1821_v42 = vpop.f32.mrb[10].mxu1  ;;  %v834_v43 = vpop.f32.mrb[11].mxu0 }
 0x169   :  { %v1011_v45 = vmul.f32 %v1821_v42, %v3272_v25  ;;  %v845_v46 = vmul.f32 %v834_v43, %v3274_v28  ;;  %v999_v47 = vpop.f32.mrb[11].mxu1  ;;  %2112 = vlog2.f32 %v371_v50 }
 0x16a   :  { %v1010_v48 = vmul.f32 %v999_v47, %v3274_v28 }
 0x16b   :  { %v848_v49 = vadd.f32 %v847_v38, %v845_v46 }
 0x16c   :  { %v1013_v51 = vadd.f32 %v1012_v40, %v1010_v48 }
 0x16d   :  { %v849_v52 = vadd.f32 %v848_v49, %v846_v41 }
 0x16e   :  { %v1014_v53 = vadd.f32 %v1013_v51, %v1011_v45 }
 0x16f   :  { %v850_v54 = vrot.slane %v849_v52, 4 }
 0x170   :  { %v1015_v55 = vrot.slane %v1014_v53, 4 }
 0x171   :  { %v2109_v56 = vpop.eup %2108  ;;  %v851_v57 = vadd.f32 %v850_v54, %v849_v52 }
 0x172   :  { %v2111_v58 = vpop.eup %2110  ;;  %v535_v59 = vadd.f32 1.0, %v2109_v56  ;;  %v1016_v60 = vadd.f32 %v1015_v55, %v1014_v53 }
 0x173   :  { %v852_v61 = vrot.slane %v851_v57, 2  ;;  %v700_v63 = vadd.f32 1.0, %v2111_v58  ;;  %v2113_v18 = vpop.eup %2112 }
 0x174   :  { %v1017_v0 = vrot.slane %v1016_v60, 2  ;;  %2114 = vlog2.f32 %v535_v59  ;;  %v373_v4 = vmul.f32 0.6931472, %v2113_v18 }
 0x175   :  { %v853_v7 = vadd.f32 %v852_v61, %v851_v57  ;;  %2116 = vlog2.f32 %v700_v63 }
 0x176   :  { %v1018_v8 = vadd.f32 %v1017_v0, %v1016_v60  ;;  %v374_v29 = vadd.f32 %v373_v4, %v366_v12 }
 0x177   :  { %v854_v9 = vrot.slane %v853_v7, 1 }
 0x178   :  { %v1019_v14 = vrot.slane %v1018_v8, 1 }
 0x179   :  { %v855_v15 = vadd.f32 %v854_v9, %v853_v7 }
 0x17a   :  { %v1020_v19 = vadd.f32 %v1019_v14, %v1018_v8 }
 0x17b   :  { %v1385_v22 = vclamps-f32 %v855_v15, 4.0 }
 0x17c   :  { %v1419_v23 = vclamps-f32 %v1020_v19, 4.0 }
 0x17d   :  { %v858_v3 = vsub.f32 0.0, %v1385_v22 }
 0x17e   :  { %v2115_v5 = vpop.eup %2114  ;;  %v1023_v6 = vsub.f32 0.0, %v1419_v23 }
 0x17f   :  { %v2117_v11 = vpop.eup %2116  ;;  %v859_v21 = vsub.f32 0.0, %v858_v3  ;;  %v537_v24 = vmul.f32 0.6931472, %v2115_v5 }
 0x180   :  { %v702_v26 = vmul.f32 0.6931472, %v2117_v11  ;;  %v1024_v27 = vsub.f32 0.0, %v1023_v6 }
 0x181   :  { %v861_v10 = vand.u32 2147483647, %v859_v21  ;;  %v538_v30 = vadd.f32 %v537_v24, %v530_v16  ;;  %v860_v58 = vmax.f32 %v859_v21, 0.0 }
 0x182   :  { %v1026_v32 = vand.u32 2147483647, %v1024_v27  ;;  %v703_v36 = vadd.f32 %v702_v26, %v695_v31  ;;  %v1025_v0 = vmax.f32 %v1024_v27, 0.0 }
 0x183   :  { %v862_v33 = vsub.f32 0.0, %v861_v10  ;;  %v1856_v34 = vpop.f32.mrb[12].mxu0  ;;  %v539_v35 = vadd.f32 %v538_v30, %v374_v29 }
 0x184   :  { %v1174_v37 = vmul.f32 %v1856_v34, %v3266_v1  ;;  %v1859_v38 = vpop.f32.mrb[12].mxu1  ;;  %v1154_v62 = vpop.f32.mrb[13].mxu0  ;;  %v1027_v2 = vsub.f32 0.0, %v1026_v32 }
 0x185   :  { %v863_v39 = vmul.f32 1.442695, %v862_v33  ;;  %v1176_v40 = vmul.f32 %v1859_v38, %v3272_v25  ;;  %v1173_v41 = vmul.f32 %v1154_v62, %v3268_v13  ;;  %v1164_v42 = vpop.f32.mrb[13].mxu1  ;;  %v704_v43 = vadd.f32 %v703_v36, %v539_v35 }
 0x186   :  { %v1175_v17 = vmul.f32 %v1164_v42, %v3274_v28  ;;  %v1028_v20 = vmul.f32 1.442695, %v1027_v2 }
 0x187   :  { %2118 = vpow2.f32 %v863_v39  ;;  %v1177_v44 = vadd.f32 %v1174_v37, %v1173_v41 }
 0x188   :  { %2120 = vpow2.f32 %v1028_v20 }
 0x189   :  { %v1178_v45 = vadd.f32 %v1177_v44, %v1175_v17 }
 0x18b   :  { %v1179_v46 = vadd.f32 %v1178_v45, %v1176_v40 }
 0x18d   :  { %v1180_v47 = vrot.slane %v1179_v46, 4 }
 0x18f   :  { %v1181_v1 = vadd.f32 %v1180_v47, %v1179_v46 }
 0x191   :  { %v2119_v48 = vpop.eup %2118  ;;  %v1182_v49 = vrot.slane %v1181_v1, 2 }
 0x192   :  { %v2121_v50 = vpop.eup %2120  ;;  %v865_v51 = vadd.f32 1.0, %v2119_v48 }
 0x193   :  { %v1183_v52 = vadd.f32 %v1182_v49, %v1181_v1  ;;  %v1030_v25 = vadd.f32 1.0, %v2121_v50 }
 0x194   :  { %2122 = vlog2.f32 %v865_v51 }
 0x195   :  { %v1184_v13 = vrot.slane %v1183_v52, 1  ;;  %2124 = vlog2.f32 %v1030_v25 }
 0x197   :  { %v1185_v53 = vadd.f32 %v1184_v13, %v1183_v52 }
 0x199   :  { %v1453_v54 = vclamps-f32 %v1185_v53, 4.0 }
 0x19b   :  { %v1188_v28 = vsub.f32 0.0, %v1453_v54 }
 0x19d   :  { %v1189_v55 = vsub.f32 0.0, %v1188_v28 }
 0x19e   :  { %v2123_v56 = vpop.eup %2122 }
 0x19f   :  { %v2125_v57 = vpop.eup %2124  ;;  %v867_v59 = vmul.f32 0.6931472, %v2123_v56  ;;  %v1191_v60 = vand.u32 2147483647, %v1189_v55  ;;  %v1190_v23 = vmax.f32 %v1189_v55, 0.0 }
 0x1a0   :  { %v1032_v61 = vmul.f32 0.6931472, %v2125_v57 }
 0x1a1   :  { %v868_v63 = vadd.f32 %v867_v59, %v860_v58  ;;  %v1192_v7 = vsub.f32 0.0, %v1191_v60 }
 0x1a2   :  { %v1033_v9 = vadd.f32 %v1032_v61, %v1025_v0 }
 0x1a3   :  { %v869_v8 = vadd.f32 %v868_v63, %v704_v43  ;;  %v1193_v14 = vmul.f32 1.442695, %v1192_v7 }
 0x1a5   :  { %v1034_v15 = vadd.f32 %v1033_v9, %v869_v8  ;;  %2126 = vpow2.f32 %v1193_v14 }
 0x1af   :  { %v2127_v18 = vpop.eup %2126 }
 0x1b0   :  { %v1195_v19 = vadd.f32 1.0, %v2127_v18 }
 0x1b2   :  { %2128 = vlog2.f32 %v1195_v19 }
 0x1bc   :  { %v2129_v22 = vpop.eup %2128 }
 0x1bd   :  { %v1197_v3 = vmul.f32 0.6931472, %v2129_v22 }
 0x1bf   :  { %v1198_v4 = vadd.f32 %v1197_v3, %v1190_v23 }
 0x1c1   :  { %v1199_v5 = vadd.f32 %v1198_v4, %v1034_v15 }
 0x1c3   :  { %1200 = vst [vmem:[#allocation7] sm:$0x1] %v1199_v5 }
 0x1c4   :  { %2185 = shalt.err (!%p2182_p6)
}
 0x1c5   :  { %s2186_s9 = scalar_lea.hbm %s3329_s5, 16 }
 0x1c6   :  { %p2187_p7 = scmp.ne.s32.totalorder %s3329_s5, %s2186_s9  ;;  %p2190_p8 = scmp.lt.u32.totalorder %s2186_s9, %s3329_s5 }
 0x1c8   :  { %p2192_p9 = pnand %p2190_p8, %p2187_p7 }
 0x1ca   :  { %2195 = shalt.err (!%p2192_p9)
}
 0x1cb   :  { %1210 = dma.vmem_to_hbm [thread:$0]  %s1208_s29, 16, %s3329_s5, [#allocation4]  }
 0x1cc   :  { %2200 = dma.done.wait [#allocation4], 16  }
 0x1cd   :  { %2201 = vsyncadd [#allocation4], 4294967280 }
 0x1ce   :  { %1214 = vsyncpa [#allocation3], 1 }
 0x1cf   :  { %1215 = vsyncpa [#allocation6], 1 }
 0x1d0   :  { %1216 = vsyncpa [#allocation4], 1 }

</bundles_post_ra>
